<compile_context>
chip_gen: v7x
topology: tpu7x:2x2x1
jax: 0.10.0
libtpu: 0.0.40
codegen_flags: <defaults>
</compile_context>

<pallas_src>
import functools

import jax
import jax.numpy as jnp
from jax import lax
from jax.experimental import pallas as pl
from jax.experimental.pallas import tpu as pltpu

IN_DIM = 784  # fixed by the module: nn.Linear(784, hidden_dim)


def _softplus(x):
    # Numerically-stable softplus: max(x, 0) + log1p(exp(-|x|))
    return jnp.maximum(x, 0.0) + jnp.log1p(jnp.exp(-jnp.abs(x)))


def _round_up(n, m):
    return ((n + m - 1) // m) * m


def encoder_kernel(x_ref, w1_ref, b1_ref, wh_ref, bh_ref, out_ref, *, z_dim):
    # x_ref:  [TB, 784]      w1_ref: [784, H]      b1_ref: [1, H]
    # wh_ref: [H, 2Z] (mean cols || std cols)      bh_ref: [1, 2Z]
    # out_ref:[TB, 2Z]  (columns [0, Z) = mean, [Z, 2Z) = std)
    x = x_ref[...]
    # Hidden layer + tanh. NOTE: for large TB, h ([TB, H] f32) lives in
    # compiler-managed VMEM (not vregs); its bytes are counted in the budget.
    h = jnp.dot(x, w1_ref[...], preferred_element_type=jnp.float32)
    h = jnp.tanh(h + b1_ref[...])                        # [TB, H]
    # Fused mean/std heads: one MXU pass instead of two.
    heads = jnp.dot(h, wh_ref[...], preferred_element_type=jnp.float32)
    heads = heads + bh_ref[...]                          # [TB, 2Z]
    # Softplus only on the std half (lane-index mask, no column slicing).
    col = lax.broadcasted_iota(jnp.int32, heads.shape, 1)
    out_ref[...] = jnp.where(col < z_dim, heads, _softplus(heads))


def pack_encoder_params(params):
    """One-time packing of the head weights for the kernel.

    Call this ONCE at parameter-setup time (not per forward) so no per-call
    concat kernels / HBM round-trips of the weights are issued."""
    wh = jnp.concatenate([params["wm"], params["ws"]], axis=1)   # [H, 2Z]
    bh = jnp.concatenate([params["bm"], params["bs"]], axis=1)   # [1, 2Z]
    return {"w1": params["w1"], "b1": params["b1"], "wh": wh, "bh": bh}


def encoder_forward(x, packed, *, batch_tile=2048, vmem_cap_bytes=40 << 20):
    """x: [B, 784] float32. packed: output of pack_encoder_params.

    Returns (mean, std), each [B, z_dim] float32.
    """
    B, in_dim = x.shape
    assert in_dim == packed["w1"].shape[0]
    H = packed["w1"].shape[1]
    two_z = packed["wh"].shape[1]
    Z = two_z // 2

    # --- batch tile selection -------------------------------------------
    # Mosaic lane-pads the K dim (784 -> 896) inside VMEM; account for it in
    # the footprint but never materialize it in HBM.
    lanes = _round_up(in_dim, 128)

    def vmem_bytes(tb):
        return 4 * (2 * tb * lanes          # double-buffered x tile
                    + 2 * tb * two_z        # double-buffered out tile
                    + tb * (H + two_z)      # compiler temps: h, heads
                    + lanes * H + H         # resident W1 + b1
                    + H * two_z + two_z)    # resident fused head W + b

    # >= 2 grid steps for moderate B (v7x megacore); multiple of 8 (sublane);
    # shrink until the VMEM footprint fits the cap.
    TB = min(_round_up(batch_tile, 8), max(8, _round_up(pl.cdiv(B, 2), 8)))
    while TB > 256 and vmem_bytes(TB) > vmem_cap_bytes:
        TB = max(256, _round_up(TB // 2, 8))

    grid = (pl.cdiv(B, TB),)   # pad-free: partial edge block is masked by Pallas

    vmem_limit = int(min(max(int(vmem_bytes(TB) * 1.25), 16 << 20), vmem_cap_bytes))

    cost = pl.CostEstimate(
        flops=2 * B * in_dim * H + 2 * B * H * two_z,
        transcendentals=B * (H + 2 * two_z),
        bytes_accessed=(B * in_dim + B * two_z
                        + in_dim * H + H + H * two_z + two_z) * 4,
    )

    slab = pl.pallas_call(
        functools.partial(encoder_kernel, z_dim=Z),
        out_shape=jax.ShapeDtypeStruct((B, two_z), jnp.float32),
        grid_spec=pltpu.PrefetchScalarGridSpec(
            num_scalar_prefetch=0,
            grid=grid,
            in_specs=[
                pl.BlockSpec((TB, in_dim), lambda i: (i, 0)),    # x tile (streamed, unpadded)
                pl.BlockSpec((in_dim, H), lambda i: (0, 0)),     # W1 (resident)
                pl.BlockSpec((1, H), lambda i: (0, 0)),          # b1 (resident)
                pl.BlockSpec((H, two_z), lambda i: (0, 0)),      # fused head W (resident)
                pl.BlockSpec((1, two_z), lambda i: (0, 0)),      # fused head b (resident)
            ],
            out_specs=pl.BlockSpec((TB, two_z), lambda i: (i, 0)),  # mean||std slab
        ),
        compiler_params=pltpu.CompilerParams(
            dimension_semantics=("parallel",),   # shard batch steps across TCs (v7x)
            vmem_limit_bytes=vmem_limit,
        ),
        cost_estimate=cost,
    )(x, packed["w1"], packed["b1"], packed["wh"], packed["bh"])

    # TODO(synk): optional bf16 streaming of x (~2x HBM win) is accuracy-gated
    # and intentionally not applied (f32 parity with the PyTorch module).
    return slab[:, :Z], slab[:, Z:]


def init_params(key, in_dim=IN_DIM, hidden_dim=500, z_dim=20):
    """Deterministic init mimicking nn.Linear's U(-1/sqrt(fan_in), 1/sqrt(fan_in)).
    Weights stored as [in_features, out_features] (transposed vs. PyTorch)."""
    ks = jax.random.split(key, 6)

    def lin(kw, kb, fan_in, fan_out):
        bound = 1.0 / jnp.sqrt(fan_in)
        w = jax.random.uniform(kw, (fan_in, fan_out), jnp.float32, -bound, bound)
        b = jax.random.uniform(kb, (1, fan_out), jnp.float32, -bound, bound)
        return w, b

    w1, b1 = lin(ks[0], ks[1], in_dim, hidden_dim)
    wm, bm = lin(ks[2], ks[3], hidden_dim, z_dim)
    ws, bs = lin(ks[4], ks[5], hidden_dim, z_dim)
    return {"w1": w1, "b1": b1, "wm": wm, "bm": bm, "ws": ws, "bs": bs}


def reference_forward(x, p):
    h = jnp.tanh(x @ p["w1"] + p["b1"])
    mean = h @ p["wm"] + p["bm"]
    std = jax.nn.softplus(h @ p["ws"] + p["bs"])
    return mean, std


if __name__ == "__main__":
    key = jax.random.PRNGKey(0)
    k_x, k_x2, k_p = jax.random.split(key, 3)

    B, IN, H, Z = 4, IN_DIM, 500, 20   # module defaults: Linear(784,500), z_dim=20
    params = init_params(k_p, in_dim=IN, hidden_dim=H, z_dim=Z)
    packed = pack_encoder_params(params)   # one-time packing, reused across calls

    # --- tiny batch (single grid step, partial edge block) ---
    x = jax.random.normal(k_x, (B, IN), dtype=jnp.float32)
    mean, std = encoder_forward(x, packed)
    jax.block_until_ready((mean, std))

    mean_ref, std_ref = reference_forward(x, params)
    assert mean.shape == (B, Z) and std.shape == (B, Z)
    assert jnp.allclose(mean, mean_ref, atol=1e-5, rtol=1e-5)
    assert jnp.allclose(std, std_ref, atol=1e-5, rtol=1e-5)
    assert bool(jnp.all(std > 0))

    # --- batch not divisible by the tile (grid > 1, masked tail block) ---
    B2 = 300
    x2 = jax.random.normal(k_x2, (B2, IN), dtype=jnp.float32)
    mean2, std2 = encoder_forward(x2, packed, batch_tile=128)
    jax.block_until_ready((mean2, std2))

    mean2_ref, std2_ref = reference_forward(x2, params)
    assert mean2.shape == (B2, Z) and std2.shape == (B2, Z)
    assert jnp.allclose(mean2, mean2_ref, atol=1e-5, rtol=1e-5)
    assert jnp.allclose(std2, std2_ref, atol=1e-5, rtol=1e-5)
    assert bool(jnp.all(std2 > 0))

    # --- default (large) tile path: >=2 grid steps chosen automatically ---
    mean3, std3 = encoder_forward(x2, packed)
    jax.block_until_ready((mean3, std3))
    assert jnp.allclose(mean3, mean2_ref, atol=1e-5, rtol=1e-5)
    assert jnp.allclose(std3, std2_ref, atol=1e-5, rtol=1e-5)

    print("KERNEL_OK")
</pallas_src>

<mosaic_0001>
module attributes {stable_mosaic.version = 11 : i64} {
  func.func @encoder_kernel(%arg0: i32, %arg1: memref<8x784xf32, #tpu.memory_space<vmem>>, %arg2: memref<784x500xf32, #tpu.memory_space<vmem>>, %arg3: memref<1x500xf32, #tpu.memory_space<vmem>>, %arg4: memref<500x40xf32, #tpu.memory_space<vmem>>, %arg5: memref<1x40xf32, #tpu.memory_space<vmem>>, %arg6: memref<8x40xf32, #tpu.memory_space<vmem>>) attributes {dimension_semantics = [#tpu.dimension_semantics<parallel>], iteration_bounds = array<i64: 1>, scalar_prefetch = 0 : i64, scratch_operands = 0 : i64, tpu.core_type = #tpu.core_type<tc>, window_params = [{transform_indices = @transform_0, window_bounds = array<i64: 8, 784>}, {pipeline_mode = #tpu.pipeline_mode<synchronous>, transform_indices = @transform_1, window_bounds = array<i64: 784, 500>}, {pipeline_mode = #tpu.pipeline_mode<synchronous>, transform_indices = @transform_2, window_bounds = array<i64: 1, 500>}, {pipeline_mode = #tpu.pipeline_mode<synchronous>, transform_indices = @transform_3, window_bounds = array<i64: 500, 40>}, {pipeline_mode = #tpu.pipeline_mode<synchronous>, transform_indices = @transform_4, window_bounds = array<i64: 1, 40>}, {transform_indices = @transform_5, window_bounds = array<i64: 8, 40>}]} {
    %c0 = arith.constant 0 : index
    %c0_0 = arith.constant 0 : index
    %0 = vector.load %arg1[%c0, %c0_0] : memref<8x784xf32, #tpu.memory_space<vmem>>, vector<8x784xf32>
    %c0_1 = arith.constant 0 : index
    %c0_2 = arith.constant 0 : index
    %1 = vector.load %arg2[%c0_1, %c0_2] : memref<784x500xf32, #tpu.memory_space<vmem>>, vector<784x500xf32>
    %cst = arith.constant dense<0.000000e+00> : vector<8x500xf32>
    %2 = tpu.matmul %0, %1, %cst {dimension_numbers = #tpu.dot_dimension_numbers<[1], [0], [0], [1], [0, 0, 1, 1], [], []>} : vector<8x784xf32>, vector<784x500xf32>, vector<8x500xf32> -> vector<8x500xf32>
    %c0_3 = arith.constant 0 : index
    %c0_4 = arith.constant 0 : index
    %3 = vector.load %arg3[%c0_3, %c0_4] : memref<1x500xf32, #tpu.memory_space<vmem>>, vector<1x500xf32>
    %4 = vector.broadcast %3 : vector<1x500xf32> to vector<8x500xf32>
    %5 = arith.addf %2, %4 : vector<8x500xf32>
    %6 = math.tanh %5 : vector<8x500xf32>
    %c0_5 = arith.constant 0 : index
    %c0_6 = arith.constant 0 : index
    %7 = vector.load %arg4[%c0_5, %c0_6] : memref<500x40xf32, #tpu.memory_space<vmem>>, vector<500x40xf32>
    %cst_7 = arith.constant dense<0.000000e+00> : vector<8x40xf32>
    %8 = tpu.matmul %6, %7, %cst_7 {dimension_numbers = #tpu.dot_dimension_numbers<[1], [0], [0], [1], [0, 0, 1, 1], [], []>} : vector<8x500xf32>, vector<500x40xf32>, vector<8x40xf32> -> vector<8x40xf32>
    %c0_8 = arith.constant 0 : index
    %c0_9 = arith.constant 0 : index
    %9 = vector.load %arg5[%c0_8, %c0_9] : memref<1x40xf32, #tpu.memory_space<vmem>>, vector<1x40xf32>
    %10 = vector.broadcast %9 : vector<1x40xf32> to vector<8x40xf32>
    %11 = arith.addf %8, %10 : vector<8x40xf32>
    %12 = tpu.iota {dimensions = array<i32: 1>} : vector<8x40xi32>
    %c20_i32 = arith.constant 20 : i32
    %13 = vector.broadcast %c20_i32 : i32 to vector<8x40xi32>
    %14 = arith.cmpi slt, %12, %13 : vector<8x40xi32>
    %cst_10 = arith.constant 0.000000e+00 : f32
    %15 = vector.broadcast %cst_10 : f32 to vector<8x40xf32>
    %16 = arith.maximumf %11, %15 : vector<8x40xf32>
    %17 = math.absf %11 : vector<8x40xf32>
    %cst_11 = arith.constant 0.000000e+00 : f32
    %18 = vector.broadcast %cst_11 : f32 to vector<8x40xf32>
    %19 = arith.subf %18, %17 : vector<8x40xf32>
    %20 = math.exp %19 : vector<8x40xf32>
    %21 = math.log1p %20 : vector<8x40xf32>
    %22 = arith.addf %16, %21 : vector<8x40xf32>
    %23 = arith.select %14, %11, %22 : vector<8x40xi1>, vector<8x40xf32>
    %c0_12 = arith.constant 0 : index
    %c0_13 = arith.constant 0 : index
    %24 = vector.load %arg6[%c0_12, %c0_13] : memref<8x40xf32, #tpu.memory_space<vmem>>, vector<8x40xf32>
    tpu.vector_store %arg6[%c0_12, %c0_13], %23 {strides = array<i32>} : memref<8x40xf32, #tpu.memory_space<vmem>>, vector<8x40xf32>,
    return
  }
  func.func @transform_0(%arg0: i32) -> (i32, i32) {
    %c0_i32 = arith.constant 0 : i32
    %c0_i32_0 = arith.constant 0 : i32
    return %arg0, %c0_i32 : i32, i32
  }
  func.func @transform_1(%arg0: i32) -> (i32, i32) {
    %c0_i32 = arith.constant 0 : i32
    %c0_i32_0 = arith.constant 0 : i32
    %c0_i32_1 = arith.constant 0 : i32
    return %c0_i32, %c0_i32_0 : i32, i32
  }
  func.func @transform_2(%arg0: i32) -> (i32, i32) {
    %c0_i32 = arith.constant 0 : i32
    %c0_i32_0 = arith.constant 0 : i32
    %c0_i32_1 = arith.constant 0 : i32
    return %c0_i32, %c0_i32_0 : i32, i32
  }
  func.func @transform_3(%arg0: i32) -> (i32, i32) {
    %c0_i32 = arith.constant 0 : i32
    %c0_i32_0 = arith.constant 0 : i32
    %c0_i32_1 = arith.constant 0 : i32
    return %c0_i32, %c0_i32_0 : i32, i32
  }
  func.func @transform_4(%arg0: i32) -> (i32, i32) {
    %c0_i32 = arith.constant 0 : i32
    %c0_i32_0 = arith.constant 0 : i32
    %c0_i32_1 = arith.constant 0 : i32
    return %c0_i32, %c0_i32_0 : i32, i32
  }
  func.func @transform_5(%arg0: i32) -> (i32, i32) {
    %c0_i32 = arith.constant 0 : i32
    %c0_i32_0 = arith.constant 0 : i32
    return %arg0, %c0_i32 : i32, i32
  }
}

</mosaic_0001>

<bundles_post_ra>
// kernel: tpu_custom_call.1
= control target key start
LH: loop header
LB: loop body
LE: loop exit
PB: predicated region body
PF: predicated region fallthrough
CT: control target
= control target key end

     0   :  { %10 = vsyncpa [#allocation3], 0  ;;  %s2338_s0 = inlined_call_operand.hbm [shape: f32[4,784], index: 0, kind: input, shape index: {}]   ;;  %s2339_s1 = inlined_call_operand.hbm [shape: f32[784,500], index: 1, kind: input, shape index: {}]   ;;  %s2340_s2 = inlined_call_operand.hbm [shape: f32[1,500], index: 2, kind: input, shape index: {}]   ;;  %s2341_s3 = inlined_call_operand.vmem [shape: f32[500,40], index: 3, kind: input, shape index: {}]   ;;  %s2342_s4 = inlined_call_operand.hbm [shape: f32[1,40], index: 4, kind: input, shape index: {}]   ;;  %s2343_s5 = inlined_call_operand.hbm [shape: f32[4,40], index: 5, kind: output, shape index: {}]  }
   0x1   :  { %11 = vsyncpa [#allocation6], 0 }
   0x2   :  { %12 = vsyncpa [#allocation9], 0 }
   0x3   :  { %13 = vsyncpa [#allocation4], 0 }
   0x4   :  { %18 = vsyncadd [#allocation3], 448  ;;  %s2026_s18 = smov [#allocation5]   ;;  %s1908_s22 = scalar_lea.hbm %s2339_s1, 50176 }
   0x5   :  { %s31_s19 = sshll.u32 %s2026_s18, 4  ;;  %p1909_p0 = scmp.ne.s32.totalorder %s2339_s1, %s1908_s22  ;;  %s32_s19 = int_to_ptr.vmem [resolvable:$true] %s31_s19 }
   0x6   :  { %p1912_p1 = scmp.lt.u32.totalorder %s1908_s22, %s2339_s1 }
   0x8   :  { %p1914_p2 = pnand %p1912_p1, %p1909_p0 }
   0xa   :  { %1917 = shalt.err (!%p1914_p2)
}
   0xb   :  { %s1918_s27 = scalar_lea.vmem %s32_s19, 50176  ;;  %p1923_p4 = scmp.lt.s32.totalorder %s32_s19, %s32_s19 }
   0xc   :  { %p1919_p3 = scmp.ne.s32.totalorder %s32_s19, %s1918_s27  ;;  %p1924_p5 = scmp.lt.s32.totalorder %s1918_s27, %s1918_s27 }
   0xe   :  { %p1925_p6 = por %p1924_p5, %p1923_p4 }
  0x10   :  { %p1926_p7 = pnand %p1925_p6, %p1919_p3 }
  0x12   :  { %1929 = shalt.err (!%p1926_p7)
}
  0x13   :  { %s2027_s28 = smov 512   ;;  %s2028_s29 = smov 32  }
  0x14   :  { %37 = dma.hbm_to_vmem [thread:$0]  %s2339_s1, 50176, %s32_s19, [#allocation6], %s2027_s28, %s2027_s28, %s2028_s29  }
  0x15   :  { %s2029_s7 = smov [#allocation2]   ;;  %s1930_s11 = scalar_lea.hbm %s2338_s0, 448 }
  0x16   :  { %s19_s8 = sshll.u32 %s2029_s7, 4  ;;  %p1931_p8 = scmp.ne.s32.totalorder %s2338_s0, %s1930_s11  ;;  %s20_s8 = int_to_ptr.vmem [resolvable:$true] %s19_s8 }
  0x17   :  { %p1934_p9 = scmp.lt.u32.totalorder %s1930_s11, %s2338_s0 }
  0x19   :  { %p1936_p10 = pnand %p1934_p9, %p1931_p8 }
  0x1b   :  { %1939 = shalt.err (!%p1936_p10)
}
  0x1c   :  { %s1940_s16 = scalar_lea.vmem %s20_s8, 448  ;;  %s1944_s1 = scalar_lea.vmem %s20_s8, 896 }
  0x1d   :  { %p1941_p11 = scmp.ne.s32.totalorder %s20_s8, %s1940_s16  ;;  %p1945_p12 = scmp.lt.s32.totalorder %s20_s8, %s20_s8 }
  0x1e   :  { %p1946_p13 = scmp.lt.s32.totalorder %s1944_s1, %s1940_s16 }
  0x20   :  { %p1947_p0 = por %p1946_p13, %p1945_p12 }
  0x22   :  { %p1948_p1 = pnand %p1947_p0, %p1941_p11 }
  0x24   :  { %1951 = shalt.err (!%p1948_p1)
}
  0x25   :  { %s2030_s17 = smov 448   ;;  %s2031_s18 = smov 28  }
  0x26   :  { %25 = dma.hbm_to_vmem [thread:$0]  %s2338_s0, 448, %s20_s8, [#allocation3], %s2030_s17, %s2030_s17, %s2031_s18  }
  0x27   :  { %s2032_s21 = smov [#allocation7]   ;;  %s2033_s23 = smov [#allocation8]  }
  0x28   :  { %s44_s22 = sshll.u32 %s2032_s21, 4  ;;  %s56_s24 = sshll.u32 %s2033_s23, 4  ;;  %s45_s22 = int_to_ptr.vmem [resolvable:$true] %s44_s22  ;;  %s57_s24 = int_to_ptr.vmem [resolvable:$true] %s56_s24 }
  0x29   :  { %s1952_s27 = scalar_lea.hbm %s2340_s2, 64 }
  0x2a   :  { %p1953_p2 = scmp.ne.s32.totalorder %s2340_s2, %s1952_s27  ;;  %p1956_p3 = scmp.lt.u32.totalorder %s1952_s27, %s2340_s2 }
  0x2c   :  { %p1958_p4 = pnand %p1956_p3, %p1953_p2 }
  0x2e   :  { %1961 = shalt.err (!%p1958_p4)
}
  0x2f   :  { %s1962_s0 = scalar_lea.vmem %s45_s22, 64  ;;  %p1967_p6 = scmp.lt.s32.totalorder %s45_s22, %s45_s22 }
  0x30   :  { %p1963_p5 = scmp.ne.s32.totalorder %s45_s22, %s1962_s0  ;;  %p1968_p7 = scmp.lt.s32.totalorder %s1962_s0, %s1962_s0 }
  0x32   :  { %p1969_p8 = por %p1968_p7, %p1967_p6 }
  0x34   :  { %p1970_p9 = pnand %p1969_p8, %p1963_p5 }
  0x36   :  { %1973 = shalt.err (!%p1970_p9)
}
  0x37   :  { %47 = dma.hbm_to_vmem [thread:$0]  %s2340_s2, 64, %s45_s22, [#allocation6]  }
  0x38   :  { %s1974_s11 = scalar_lea.hbm %s2342_s4, 16 }
  0x39   :  { %p1975_p10 = scmp.ne.s32.totalorder %s2342_s4, %s1974_s11  ;;  %p1978_p11 = scmp.lt.u32.totalorder %s1974_s11, %s2342_s4 }
  0x3b   :  { %p1980_p12 = pnand %p1978_p11, %p1975_p10 }
  0x3d   :  { %1983 = shalt.err (!%p1980_p12)
}
  0x3e   :  { %s1984_s16 = scalar_lea.vmem %s57_s24, 16  ;;  %s1988_s1 = scalar_lea.vmem %s57_s24, 32 }
  0x3f   :  { %p1985_p13 = scmp.ne.s32.totalorder %s57_s24, %s1984_s16  ;;  %p1989_p0 = scmp.lt.s32.totalorder %s57_s24, %s57_s24 }
  0x40   :  { %p1990_p1 = scmp.lt.s32.totalorder %s1988_s1, %s1984_s16 }
  0x42   :  { %p1991_p2 = por %p1990_p1, %p1989_p0 }
  0x44   :  { %p1992_p3 = pnand %p1991_p2, %p1985_p13 }
  0x46   :  { %1995 = shalt.err (!%p1992_p3)
}
  0x47   :  { %59 = dma.hbm_to_vmem [thread:$0]  %s2342_s4, 16, %s57_s24, [#allocation9]  }
  0x48   :  { %2018 = dma.done.wait [#allocation3], 896  }
  0x49   :  { %2019 = vsyncadd [#allocation3], 4294966400 }
  0x4a   :  { %2020 = dma.done.wait [#allocation6], 50240  }
  0x4b   :  { %2021 = vsyncadd [#allocation6], 4294917056 }
  0x4c   :  { %2022 = dma.done.wait [#allocation9], 16  }
  0x4d   :  { %2023 = vsyncadd [#allocation9], 4294967280  ;;  %v81_v0 = vld [vmem:[#allocation5 + $0x8] sm:$0xff]  ;;  %v83_v2 = vld [vmem:[#allocation5 + $0x18] sm:$0xff]  ;;  %vm515_vm0 = vcmask 130048   ;;  %vm1164_vm1 = vcmask 1043456  }
  0x4e   :  { %v85_v1 = vld [vmem:[#allocation5 + $0x28] sm:$0xff]  ;;  %v87_v4 = vld [vmem:[#allocation5 + $0x38] sm:$0xff]  ;;  %v80_v5 = vld [vmem:[#allocation5] sm:$0xff]  ;;  %vm1160_vm2 = vcmask 949248   ;;  %vm1327_vm5 = vcmask 326656  }
  0x4f   :  { %v1388_v3 = vpack.c.bf16 %v85_v1, %v81_v0  ;;  %v84_v6 = vld [vmem:[#allocation5 + $0x20] sm:$0xff]  ;;  %v1584_v7 = vpack.c.bf16 %v87_v4, %v83_v2  ;;  %v82_v9 = vld [vmem:[#allocation5 + $0x10] sm:$0xff]  ;;  %v89_v11 = vld [vmem:[#allocation5 + $0x48] sm:$0xff] }
  0x50   :  { %v1390_v8 = vpack.c.bf16 %v84_v6, %v80_v5  ;;  %v86_v10 = vld [vmem:[#allocation5 + $0x30] sm:$0xff]  ;;  %v93_v13 = vld [vmem:[#allocation5 + $0x68] sm:$0xff]  ;;  %v91_v14 = vld [vmem:[#allocation5 + $0x58] sm:$0xff] }
  0x51   :  { %1389 = vmatprep.subr.bf16.mxu0 %v1388_v3  ;;  %v1586_v12 = vpack.c.bf16 %v86_v10, %v82_v9  ;;  %v95_v15 = vld [vmem:[#allocation5 + $0x78] sm:$0xff]  ;;  %1585 = vmatprep.subr.bf16.mxu1 %v1584_v7  ;;  %v1392_v16 = vpack.c.bf16 %v93_v13, %v89_v11  ;;  %v88_v18 = vld [vmem:[#allocation5 + $0x40] sm:$0xff]  ;;  %v90_v20 = vld [vmem:[#allocation5 + $0x50] sm:$0xff] }
  0x52   :  { %1391 = vmatpush1.bf16.msra.mxu0 %v1390_v8  ;;  %v1588_v17 = vpack.c.bf16 %v95_v15, %v91_v14  ;;  %v92_v19 = vld [vmem:[#allocation5 + $0x60] sm:$0xff]  ;;  %v94_v22 = vld [vmem:[#allocation5 + $0x70] sm:$0xff]  ;;  %v97_v23 = vld [vmem:[#allocation5 + $0x88] sm:$0xff] }
  0x53   :  { %1587 = vmatpush1.bf16.msra.mxu1 %v1586_v12  ;;  %v1394_v21 = vpack.c.bf16 %v92_v19, %v88_v18  ;;  %v101_v24 = vld [vmem:[#allocation5 + $0xa8] sm:$0xff]  ;;  %1393 = vmatprep.subr.bf16.mxu0 %v1392_v16  ;;  %v1590_v25 = vpack.c.bf16 %v94_v22, %v90_v20  ;;  %v99_v27 = vld [vmem:[#allocation5 + $0x98] sm:$0xff]  ;;  %v96_v29 = vld [vmem:[#allocation5 + $0x80] sm:$0xff] }
  0x54   :  { %1589 = vmatprep.subr.bf16.mxu1 %v1588_v17  ;;  %v1396_v26 = vpack.c.bf16 %v101_v24, %v97_v23  ;;  %v103_v28 = vld [vmem:[#allocation5 + $0xb8] sm:$0xff]  ;;  %v100_v31 = vld [vmem:[#allocation5 + $0xa0] sm:$0xff]  ;;  %v98_v32 = vld [vmem:[#allocation5 + $0x90] sm:$0xff] }
  0x55   :  { %v1592_v30 = vpack.c.bf16 %v103_v28, %v99_v27  ;;  %v102_v33 = vld [vmem:[#allocation5 + $0xb0] sm:$0xff]  ;;  %v1398_v34 = vpack.c.bf16 %v100_v31, %v96_v29  ;;  %v105_v35 = vld [vmem:[#allocation5 + $0xc8] sm:$0xff]  ;;  %v107_v37 = vld [vmem:[#allocation5 + $0xd8] sm:$0xff] }
  0x56   :  { %1395 = vmatpush1.bf16.msra.mxu0 %v1394_v21  ;;  %v109_v36 = vld [vmem:[#allocation5 + $0xe8] sm:$0xff]  ;;  %v1594_v38 = vpack.c.bf16 %v102_v33, %v98_v32  ;;  %v111_v40 = vld [vmem:[#allocation5 + $0xf8] sm:$0xff]  ;;  %v104_v41 = vld [vmem:[#allocation5 + $0xc0] sm:$0xff] }
  0x57   :  { %1591 = vmatpush1.bf16.msra.mxu1 %v1590_v25  ;;  %1397 = vmatprep.subr.bf16.mxu0 %v1396_v26  ;;  %v1400_v39 = vpack.c.bf16 %v109_v36, %v105_v35  ;;  %v108_v42 = vld [vmem:[#allocation5 + $0xe0] sm:$0xff]  ;;  %v1596_v43 = vpack.c.bf16 %v111_v40, %v107_v37  ;;  %v106_v44 = vld [vmem:[#allocation5 + $0xd0] sm:$0xff]  ;;  %v113_v46 = vld [vmem:[#allocation5 + $0x108] sm:$0xff] }
  0x58   :  { %1593 = vmatprep.subr.bf16.mxu1 %v1592_v30  ;;  %v110_v45 = vld [vmem:[#allocation5 + $0xf0] sm:$0xff]  ;;  %v117_v47 = vld [vmem:[#allocation5 + $0x128] sm:$0xff]  ;;  %v115_v48 = vld [vmem:[#allocation5 + $0x118] sm:$0xff]  ;;  %v1402_v50 = vpack.c.bf16 %v108_v42, %v104_v41 }
  0x59   :  { %v119_v49 = vld [vmem:[#allocation5 + $0x138] sm:$0xff]  ;;  %v1598_v51 = vpack.c.bf16 %v110_v45, %v106_v44  ;;  %v1404_v52 = vpack.c.bf16 %v117_v47, %v113_v46  ;;  %v112_v53 = vld [vmem:[#allocation5 + $0x100] sm:$0xff]  ;;  %v114_v55 = vld [vmem:[#allocation5 + $0x110] sm:$0xff] }
  0x5a   :  { %1399 = vmatpush1.bf16.msra.mxu0 %v1398_v34  ;;  %v116_v54 = vld [vmem:[#allocation5 + $0x120] sm:$0xff]  ;;  %v1600_v56 = vpack.c.bf16 %v119_v49, %v115_v48  ;;  %v118_v57 = vld [vmem:[#allocation5 + $0x130] sm:$0xff]  ;;  %v121_v58 = vld [vmem:[#allocation5 + $0x148] sm:$0xff] }
  0x5b   :  { %1595 = vmatpush1.bf16.msra.mxu1 %v1594_v38  ;;  %1401 = vmatprep.subr.bf16.mxu0 %v1400_v39  ;;  %v125_v59 = vld [vmem:[#allocation5 + $0x168] sm:$0xff]  ;;  %v123_v60 = vld [vmem:[#allocation5 + $0x158] sm:$0xff]  ;;  %v1406_v62 = vpack.c.bf16 %v116_v54, %v112_v53  ;;  %v1602_v63 = vpack.c.bf16 %v118_v57, %v114_v55  ;;  %v120_v1 = vld [vmem:[#allocation5 + $0x140] sm:$0xff] }
  0x5c   :  { %1597 = vmatprep.subr.bf16.mxu1 %v1596_v43  ;;  %v127_v61 = vld [vmem:[#allocation5 + $0x178] sm:$0xff]  ;;  %v1408_v0 = vpack.c.bf16 %v125_v59, %v121_v58  ;;  %v124_v2 = vld [vmem:[#allocation5 + $0x160] sm:$0xff]  ;;  %v122_v3 = vld [vmem:[#allocation5 + $0x150] sm:$0xff] }
  0x5d   :  { %v1604_v4 = vpack.c.bf16 %v127_v61, %v123_v60  ;;  %v126_v5 = vld [vmem:[#allocation5 + $0x170] sm:$0xff]  ;;  %v129_v6 = vld [vmem:[#allocation5 + $0x188] sm:$0xff]  ;;  %v131_v8 = vld [vmem:[#allocation5 + $0x198] sm:$0xff]  ;;  %v1410_v10 = vpack.c.bf16 %v124_v2, %v120_v1 }
  0x5e   :  { %1403 = vmatpush1.bf16.msra.mxu0 %v1402_v50  ;;  %v133_v7 = vld [vmem:[#allocation5 + $0x1a8] sm:$0xff]  ;;  %v135_v9 = vld [vmem:[#allocation5 + $0x1b8] sm:$0xff]  ;;  %v1606_v11 = vpack.c.bf16 %v126_v5, %v122_v3  ;;  %v128_v13 = vld [vmem:[#allocation5 + $0x180] sm:$0xff] }
  0x5f   :  { %1599 = vmatpush1.bf16.msra.mxu1 %v1598_v51  ;;  %1405 = vmatprep.subr.bf16.mxu0 %v1404_v52  ;;  %v1412_v12 = vpack.c.bf16 %v133_v7, %v129_v6  ;;  %v132_v14 = vld [vmem:[#allocation5 + $0x1a0] sm:$0xff]  ;;  %v130_v15 = vld [vmem:[#allocation5 + $0x190] sm:$0xff]  ;;  %v1608_v16 = vpack.c.bf16 %v135_v9, %v131_v8  ;;  %v137_v18 = vld [vmem:[#allocation5 + $0x1c8] sm:$0xff] }
  0x60   :  { %1601 = vmatprep.subr.bf16.mxu1 %v1600_v56  ;;  %v134_v17 = vld [vmem:[#allocation5 + $0x1b0] sm:$0xff]  ;;  %v141_v19 = vld [vmem:[#allocation5 + $0x1e8] sm:$0xff]  ;;  %v139_v20 = vld [vmem:[#allocation5 + $0x1d8] sm:$0xff]  ;;  %v1414_v22 = vpack.c.bf16 %v132_v14, %v128_v13 }
  0x61   :  { %v143_v21 = vld [vmem:[#allocation5 + $0x1f8] sm:$0xff]  ;;  %v1610_v23 = vpack.c.bf16 %v134_v17, %v130_v15  ;;  %v1416_v24 = vpack.c.bf16 %v141_v19, %v137_v18  ;;  %v136_v25 = vld [vmem:[#allocation5 + $0x1c0] sm:$0xff]  ;;  %v138_v27 = vld [vmem:[#allocation5 + $0x1d0] sm:$0xff] }
  0x62   :  { %1407 = vmatpush1.bf16.msra.mxu0 %v1406_v62  ;;  %v140_v26 = vld [vmem:[#allocation5 + $0x1e0] sm:$0xff]  ;;  %v1612_v28 = vpack.c.bf16 %v143_v21, %v139_v20  ;;  %v142_v29 = vld [vmem:[#allocation5 + $0x1f0] sm:$0xff]  ;;  %v145_v30 = vld [vmem:[#allocation5 + $0x208] sm:$0xff] }
  0x63   :  { %1603 = vmatpush1.bf16.msra.mxu1 %v1602_v63  ;;  %1409 = vmatprep.subr.bf16.mxu0 %v1408_v0  ;;  %v149_v31 = vld [vmem:[#allocation5 + $0x228] sm:$0xff]  ;;  %v147_v32 = vld [vmem:[#allocation5 + $0x218] sm:$0xff]  ;;  %v1418_v34 = vpack.c.bf16 %v140_v26, %v136_v25  ;;  %v1614_v35 = vpack.c.bf16 %v142_v29, %v138_v27  ;;  %v144_v37 = vld [vmem:[#allocation5 + $0x200] sm:$0xff] }
  0x64   :  { %1605 = vmatprep.subr.bf16.mxu1 %v1604_v4  ;;  %v151_v33 = vld [vmem:[#allocation5 + $0x238] sm:$0xff]  ;;  %v1420_v36 = vpack.c.bf16 %v149_v31, %v145_v30  ;;  %v148_v38 = vld [vmem:[#allocation5 + $0x220] sm:$0xff]  ;;  %v146_v39 = vld [vmem:[#allocation5 + $0x210] sm:$0xff] }
  0x65   :  { %v1616_v40 = vpack.c.bf16 %v151_v33, %v147_v32  ;;  %v150_v41 = vld [vmem:[#allocation5 + $0x230] sm:$0xff]  ;;  %v153_v42 = vld [vmem:[#allocation5 + $0x248] sm:$0xff]  ;;  %v155_v44 = vld [vmem:[#allocation5 + $0x258] sm:$0xff]  ;;  %v1422_v46 = vpack.c.bf16 %v148_v38, %v144_v37 }
  0x66   :  { %1411 = vmatpush1.bf16.msra.mxu0 %v1410_v10  ;;  %v157_v43 = vld [vmem:[#allocation5 + $0x268] sm:$0xff]  ;;  %v159_v45 = vld [vmem:[#allocation5 + $0x278] sm:$0xff]  ;;  %v1618_v47 = vpack.c.bf16 %v150_v41, %v146_v39  ;;  %v152_v49 = vld [vmem:[#allocation5 + $0x240] sm:$0xff] }
  0x67   :  { %1607 = vmatpush1.bf16.msra.mxu1 %v1606_v11  ;;  %1413 = vmatprep.subr.bf16.mxu0 %v1412_v12  ;;  %v1424_v48 = vpack.c.bf16 %v157_v43, %v153_v42  ;;  %v156_v50 = vld [vmem:[#allocation5 + $0x260] sm:$0xff]  ;;  %v154_v51 = vld [vmem:[#allocation5 + $0x250] sm:$0xff]  ;;  %v1620_v52 = vpack.c.bf16 %v159_v45, %v155_v44  ;;  %v161_v54 = vld [vmem:[#allocation5 + $0x288] sm:$0xff] }
  0x68   :  { %1609 = vmatprep.subr.bf16.mxu1 %v1608_v16  ;;  %v158_v53 = vld [vmem:[#allocation5 + $0x270] sm:$0xff]  ;;  %v165_v55 = vld [vmem:[#allocation5 + $0x2a8] sm:$0xff]  ;;  %v163_v56 = vld [vmem:[#allocation5 + $0x298] sm:$0xff]  ;;  %v1426_v58 = vpack.c.bf16 %v156_v50, %v152_v49 }
  0x69   :  { %v167_v57 = vld [vmem:[#allocation5 + $0x2b8] sm:$0xff]  ;;  %v1622_v59 = vpack.c.bf16 %v158_v53, %v154_v51  ;;  %v1428_v60 = vpack.c.bf16 %v165_v55, %v161_v54  ;;  %v160_v61 = vld [vmem:[#allocation5 + $0x280] sm:$0xff]  ;;  %v162_v63 = vld [vmem:[#allocation5 + $0x290] sm:$0xff] }
  0x6a   :  { %1415 = vmatpush1.bf16.msra.mxu0 %v1414_v22  ;;  %v164_v62 = vld [vmem:[#allocation5 + $0x2a0] sm:$0xff]  ;;  %v1624_v0 = vpack.c.bf16 %v167_v57, %v163_v56  ;;  %v166_v1 = vld [vmem:[#allocation5 + $0x2b0] sm:$0xff]  ;;  %v169_v2 = vld [vmem:[#allocation5 + $0x2c8] sm:$0xff] }
  0x6b   :  { %1611 = vmatpush1.bf16.msra.mxu1 %v1610_v23  ;;  %1417 = vmatprep.subr.bf16.mxu0 %v1416_v24  ;;  %v173_v3 = vld [vmem:[#allocation5 + $0x2e8] sm:$0xff]  ;;  %v171_v4 = vld [vmem:[#allocation5 + $0x2d8] sm:$0xff]  ;;  %v1430_v6 = vpack.c.bf16 %v164_v62, %v160_v61  ;;  %v168_v7 = vld [vmem:[#allocation5 + $0x2c0] sm:$0xff]  ;;  %v1626_v9 = vpack.c.bf16 %v166_v1, %v162_v63 }
  0x6c   :  { %1613 = vmatprep.subr.bf16.mxu1 %v1612_v28  ;;  %v175_v5 = vld [vmem:[#allocation5 + $0x2f8] sm:$0xff]  ;;  %v172_v8 = vld [vmem:[#allocation5 + $0x2e0] sm:$0xff]  ;;  %v1432_v10 = vpack.c.bf16 %v173_v3, %v169_v2  ;;  %v170_v11 = vld [vmem:[#allocation5 + $0x2d0] sm:$0xff] }
  0x6d   :  { %v174_v12 = vld [vmem:[#allocation5 + $0x2f0] sm:$0xff]  ;;  %v177_v13 = vld [vmem:[#allocation5 + $0x308] sm:$0xff]  ;;  %v1628_v14 = vpack.c.bf16 %v175_v5, %v171_v4  ;;  %v179_v16 = vld [vmem:[#allocation5 + $0x318] sm:$0xff]  ;;  %v1434_v19 = vpack.c.bf16 %v172_v8, %v168_v7 }
  0x6e   :  { %1419 = vmatpush1.bf16.msra.mxu0 %v1418_v34  ;;  %v181_v15 = vld [vmem:[#allocation5 + $0x328] sm:$0xff]  ;;  %v183_v17 = vld [vmem:[#allocation5 + $0x338] sm:$0xff]  ;;  %v1630_v20 = vpack.c.bf16 %v174_v12, %v170_v11  ;;  %v176_v22 = vld [vmem:[#allocation5 + $0x300] sm:$0xff] }
  0x6f   :  { %1615 = vmatpush1.bf16.msra.mxu1 %v1614_v35  ;;  %1421 = vmatprep.subr.bf16.mxu0 %v1420_v36  ;;  %v1888_v18 = vld [vmem:[#allocation2 + $0x4] ss:$28 sps:$4 sm:$0xff]   ;;  %v1436_v21 = vpack.c.bf16 %v181_v15, %v177_v13  ;;  %v180_v23 = vld [vmem:[#allocation5 + $0x320] sm:$0xff]  ;;  %v178_v24 = vld [vmem:[#allocation5 + $0x310] sm:$0xff]  ;;  %v1632_v25 = vpack.c.bf16 %v183_v17, %v179_v16 }
  0x70   :  { %1617 = vmatprep.subr.bf16.mxu1 %v1616_v40  ;;  %v182_v26 = vld [vmem:[#allocation5 + $0x330] sm:$0xff]  ;;  %v185_v27 = vld [vmem:[#allocation5 + $0x348] sm:$0xff]  ;;  %582 = vmatprep.mubr.f32.mxu0 %v1888_v18  ;;  %v187_v29 = vld [vmem:[#allocation5 + $0x358] sm:$0xff]  ;;  %v1438_v31 = vpack.c.bf16 %v180_v23, %v176_v22 }
  0x71   :  { %v189_v28 = vld [vmem:[#allocation5 + $0x368] sm:$0xff]  ;;  %v191_v30 = vld [vmem:[#allocation5 + $0x378] sm:$0xff]  ;;  %866 = vmatprep.mubr.f32.mxu1 %v1888_v18  ;;  %v1634_v32 = vpack.c.bf16 %v182_v26, %v178_v24  ;;  %v184_v34 = vld [vmem:[#allocation5 + $0x340] sm:$0xff] }
  0x72   :  { %1423 = vmatpush1.bf16.msra.mxu0 %v1422_v46  ;;  %v1440_v33 = vpack.c.bf16 %v189_v28, %v185_v27  ;;  %v188_v35 = vld [vmem:[#allocation5 + $0x360] sm:$0xff]  ;;  %v186_v36 = vld [vmem:[#allocation5 + $0x350] sm:$0xff]  ;;  %v1636_v37 = vpack.c.bf16 %v191_v30, %v187_v29  ;;  %v193_v39 = vld [vmem:[#allocation5 + $0x388] sm:$0xff] }
  0x73   :  { %1619 = vmatpush1.bf16.msra.mxu1 %v1618_v47  ;;  %1425 = vmatprep.subr.bf16.mxu0 %v1424_v48  ;;  %v190_v38 = vld [vmem:[#allocation5 + $0x370] sm:$0xff]  ;;  %v197_v40 = vld [vmem:[#allocation5 + $0x3a8] sm:$0xff]  ;;  %v195_v41 = vld [vmem:[#allocation5 + $0x398] sm:$0xff]  ;;  %v1442_v43 = vpack.c.bf16 %v188_v35, %v184_v34 }
  0x74   :  { %1621 = vmatprep.subr.bf16.mxu1 %v1620_v52  ;;  %v199_v42 = vld [vmem:[#allocation5 + $0x3b8] sm:$0xff]  ;;  %v1638_v44 = vpack.c.bf16 %v190_v38, %v186_v36  ;;  %v1444_v45 = vpack.c.bf16 %v197_v40, %v193_v39  ;;  %v192_v46 = vld [vmem:[#allocation5 + $0x380] sm:$0xff]  ;;  %v194_v48 = vld [vmem:[#allocation5 + $0x390] sm:$0xff] }
  0x75   :  { %v196_v47 = vld [vmem:[#allocation5 + $0x3a0] sm:$0xff]  ;;  %v1640_v49 = vpack.c.bf16 %v199_v42, %v195_v41  ;;  %v198_v50 = vld [vmem:[#allocation5 + $0x3b0] sm:$0xff]  ;;  %v201_v51 = vld [vmem:[#allocation5 + $0x3c8] sm:$0xff] }
  0x76   :  { %1427 = vmatpush1.bf16.msra.mxu0 %v1426_v58  ;;  %v205_v52 = vld [vmem:[#allocation5 + $0x3e8] sm:$0xff]  ;;  %v203_v53 = vld [vmem:[#allocation5 + $0x3d8] sm:$0xff]  ;;  %v1446_v55 = vpack.c.bf16 %v196_v47, %v192_v46  ;;  %v1642_v56 = vpack.c.bf16 %v198_v50, %v194_v48  ;;  %v200_v58 = vld [vmem:[#allocation5 + $0x3c0] sm:$0xff] }
  0x77   :  { %1623 = vmatpush1.bf16.msra.mxu1 %v1622_v59  ;;  %1429 = vmatprep.subr.bf16.mxu0 %v1428_v60  ;;  %v207_v54 = vld [vmem:[#allocation5 + $0x3f8] sm:$0xff]  ;;  %v1448_v57 = vpack.c.bf16 %v205_v52, %v201_v51  ;;  %v204_v59 = vld [vmem:[#allocation5 + $0x3e0] sm:$0xff]  ;;  %v202_v60 = vld [vmem:[#allocation5 + $0x3d0] sm:$0xff] }
  0x78   :  { %1625 = vmatprep.subr.bf16.mxu1 %v1624_v0  ;;  %v1644_v61 = vpack.c.bf16 %v207_v54, %v203_v53  ;;  %v206_v62 = vld [vmem:[#allocation5 + $0x3f0] sm:$0xff]  ;;  %v209_v63 = vld [vmem:[#allocation5 + $0x408] sm:$0xff]  ;;  %v211_v1 = vld [vmem:[#allocation5 + $0x418] sm:$0xff]  ;;  %v1450_v3 = vpack.c.bf16 %v204_v59, %v200_v58 }
  0x79   :  { %v213_v0 = vld [vmem:[#allocation5 + $0x428] sm:$0xff]  ;;  %v215_v2 = vld [vmem:[#allocation5 + $0x438] sm:$0xff]  ;;  %v1646_v4 = vpack.c.bf16 %v206_v62, %v202_v60  ;;  %v212_v7 = vld [vmem:[#allocation5 + $0x420] sm:$0xff] }
  0x7a   :  { %1431 = vmatpush1.bf16.msra.mxu0 %v1430_v6  ;;  %v1452_v5 = vpack.c.bf16 %v213_v0, %v209_v63  ;;  %v208_v6 = vld [vmem:[#allocation5 + $0x400] sm:$0xff]  ;;  %v210_v8 = vld [vmem:[#allocation5 + $0x410] sm:$0xff]  ;;  %v217_v11 = vld [vmem:[#allocation5 + $0x448] sm:$0xff] }
  0x7b   :  { %1627 = vmatpush1.bf16.msra.mxu1 %v1626_v9  ;;  %1433 = vmatprep.subr.bf16.mxu0 %v1432_v10  ;;  %v1648_v9 = vpack.c.bf16 %v215_v2, %v211_v1  ;;  %v214_v10 = vld [vmem:[#allocation5 + $0x430] sm:$0xff]  ;;  %v221_v12 = vld [vmem:[#allocation5 + $0x468] sm:$0xff]  ;;  %v223_v15 = vld [vmem:[#allocation5 + $0x478] sm:$0xff]  ;;  %v1454_v16 = vpack.c.bf16 %v212_v7, %v208_v6 }
  0x7c   :  { %1629 = vmatprep.subr.bf16.mxu1 %v1628_v14  ;;  %v1886_v13 = vld [vmem:[#allocation2] ss:$28 sps:$4 sm:$0xff]   ;;  %v219_v14 = vld [vmem:[#allocation5 + $0x458] sm:$0xff]  ;;  %v1650_v17 = vpack.c.bf16 %v214_v10, %v210_v8  ;;  %v1456_v18 = vpack.c.bf16 %v221_v12, %v217_v11  ;;  %v222_v23 = vld [vmem:[#allocation5 + $0x470] sm:$0xff] }
  0x7d   :  { %v1652_v22 = vpack.c.bf16 %v223_v15, %v219_v14  ;;  %v225_v24 = vld [vmem:[#allocation5 + $0x488] sm:$0xff]  ;;  %v227_v26 = vld [vmem:[#allocation5 + $0x498] sm:$0xff]  ;;  %v230_v35 = vld [vmem:[#allocation5 + $0x4b0] sm:$0xff] }
  0x7e   :  { %1435 = vmatpush1.bf16.msra.mxu0 %v1434_v19  ;;  %v216_v19 = vld [vmem:[#allocation5 + $0x440] sm:$0xff]  ;;  %v231_v27 = vld [vmem:[#allocation5 + $0x4b8] sm:$0xff]  ;;  %v233_v36 = vld [vmem:[#allocation5 + $0x4c8] sm:$0xff] }
  0x7f   :  { %1631 = vmatpush1.bf16.msra.mxu1 %v1630_v20  ;;  %1437 = vmatprep.subr.bf16.mxu0 %v1436_v21  ;;  %v220_v20 = vld [vmem:[#allocation5 + $0x460] sm:$0xff]  ;;  %v218_v21 = vld [vmem:[#allocation5 + $0x450] sm:$0xff]  ;;  %v1656_v34 = vpack.c.bf16 %v231_v27, %v227_v26  ;;  %v235_v38 = vld [vmem:[#allocation5 + $0x4d8] sm:$0xff] }
  0x80   :  { %1633 = vmatprep.subr.bf16.mxu1 %v1632_v25  ;;  %v229_v25 = vld [vmem:[#allocation5 + $0x4a8] sm:$0xff]  ;;  %v1458_v28 = vpack.c.bf16 %v220_v20, %v216_v19  ;;  %v1654_v29 = vpack.c.bf16 %v222_v23, %v218_v21  ;;  %v239_v39 = vld [vmem:[#allocation5 + $0x4f8] sm:$0xff]  ;;  %v238_v47 = vld [vmem:[#allocation5 + $0x4f0] sm:$0xff] }
  0x81   :  { %v1460_v30 = vpack.c.bf16 %v229_v25, %v225_v24  ;;  %v1660_v46 = vpack.c.bf16 %v239_v39, %v235_v38  ;;  %v241_v48 = vld [vmem:[#allocation5 + $0x508] sm:$0xff]  ;;  %v243_v50 = vld [vmem:[#allocation5 + $0x518] sm:$0xff]  ;;  %v246_v59 = vld [vmem:[#allocation5 + $0x530] sm:$0xff] }
  0x82   :  { %1439 = vmatpush1.bf16.msra.mxu0 %v1438_v31  ;;  %v224_v31 = vld [vmem:[#allocation5 + $0x480] sm:$0xff]  ;;  %v247_v51 = vld [vmem:[#allocation5 + $0x538] sm:$0xff]  ;;  %v249_v60 = vld [vmem:[#allocation5 + $0x548] sm:$0xff] }
  0x83   :  { %1635 = vmatpush1.bf16.msra.mxu1 %v1634_v32  ;;  %1441 = vmatprep.subr.bf16.mxu0 %v1440_v33  ;;  %v228_v32 = vld [vmem:[#allocation5 + $0x4a0] sm:$0xff]  ;;  %v226_v33 = vld [vmem:[#allocation5 + $0x490] sm:$0xff]  ;;  %v1664_v58 = vpack.c.bf16 %v247_v51, %v243_v50  ;;  %v251_v62 = vld [vmem:[#allocation5 + $0x558] sm:$0xff] }
  0x84   :  { %1637 = vmatprep.subr.bf16.mxu1 %v1636_v37  ;;  %v237_v37 = vld [vmem:[#allocation5 + $0x4e8] sm:$0xff]  ;;  %v1462_v40 = vpack.c.bf16 %v228_v32, %v224_v31  ;;  %v1658_v41 = vpack.c.bf16 %v230_v35, %v226_v33  ;;  %v255_v63 = vld [vmem:[#allocation5 + $0x578] sm:$0xff]  ;;  %v254_v7 = vld [vmem:[#allocation5 + $0x570] sm:$0xff] }
  0x85   :  { %v1464_v42 = vpack.c.bf16 %v237_v37, %v233_v36  ;;  %v1668_v6 = vpack.c.bf16 %v255_v63, %v251_v62  ;;  %v257_v8 = vld [vmem:[#allocation5 + $0x588] sm:$0xff]  ;;  %v259_v10 = vld [vmem:[#allocation5 + $0x598] sm:$0xff]  ;;  %v260_v14 = vld [vmem:[#allocation5 + $0x5a0] sm:$0xff] }
  0x86   :  { %1443 = vmatpush1.bf16.msra.mxu0 %v1442_v43  ;;  %v232_v43 = vld [vmem:[#allocation5 + $0x4c0] sm:$0xff]  ;;  %v263_v11 = vld [vmem:[#allocation5 + $0x5b8] sm:$0xff]  ;;  %v265_v19 = vld [vmem:[#allocation5 + $0x5c8] sm:$0xff] }
  0x87   :  { %1639 = vmatpush1.bf16.msra.mxu1 %v1638_v44  ;;  %1445 = vmatprep.subr.bf16.mxu0 %v1444_v45  ;;  %v236_v44 = vld [vmem:[#allocation5 + $0x4e0] sm:$0xff]  ;;  %v234_v45 = vld [vmem:[#allocation5 + $0x4d0] sm:$0xff]  ;;  %v1672_v20 = vpack.c.bf16 %v263_v11, %v259_v10  ;;  %v269_v21 = vld [vmem:[#allocation5 + $0x5e8] sm:$0xff] }
  0x88   :  { %1641 = vmatprep.subr.bf16.mxu1 %v1640_v49  ;;  %v245_v49 = vld [vmem:[#allocation5 + $0x528] sm:$0xff]  ;;  %v1466_v52 = vpack.c.bf16 %v236_v44, %v232_v43  ;;  %v1662_v53 = vpack.c.bf16 %v238_v47, %v234_v45  ;;  %v271_v23 = vld [vmem:[#allocation5 + $0x5f8] sm:$0xff]  ;;  %v1891_v24 = vld [vmem:[#allocation2 + $0xc] ss:$28 sps:$4 sm:$0xff]   ;;  %v1480_v27 = vpack.c.bf16 %v269_v21, %v265_v19 }
  0x89   :  { %v1468_v54 = vpack.c.bf16 %v245_v49, %v241_v48  ;;  %v270_v32 = vld [vmem:[#allocation5 + $0x5f0] sm:$0xff]  ;;  %v273_v33 = vld [vmem:[#allocation5 + $0x608] sm:$0xff]  ;;  %v275_v35 = vld [vmem:[#allocation5 + $0x618] sm:$0xff] }
  0x8a   :  { %1447 = vmatpush1.bf16.msra.mxu0 %v1446_v55  ;;  %v240_v55 = vld [vmem:[#allocation5 + $0x500] sm:$0xff]  ;;  %v279_v36 = vld [vmem:[#allocation5 + $0x638] sm:$0xff]  ;;  %v278_v44 = vld [vmem:[#allocation5 + $0x630] sm:$0xff] }
  0x8b   :  { %1643 = vmatpush1.bf16.msra.mxu1 %v1642_v56  ;;  %1449 = vmatprep.subr.bf16.mxu0 %v1448_v57  ;;  %v244_v56 = vld [vmem:[#allocation5 + $0x520] sm:$0xff]  ;;  %v242_v57 = vld [vmem:[#allocation5 + $0x510] sm:$0xff]  ;;  %v1680_v43 = vpack.c.bf16 %v279_v36, %v275_v35  ;;  %v281_v45 = vld [vmem:[#allocation5 + $0x648] sm:$0xff] }
  0x8c   :  { %1645 = vmatprep.subr.bf16.mxu1 %v1644_v61  ;;  %v253_v61 = vld [vmem:[#allocation5 + $0x568] sm:$0xff]  ;;  %v1470_v0 = vpack.c.bf16 %v244_v56, %v240_v55  ;;  %v1666_v1 = vpack.c.bf16 %v246_v59, %v242_v57  ;;  %v283_v47 = vld [vmem:[#allocation5 + $0x658] sm:$0xff]  ;;  %v286_v56 = vld [vmem:[#allocation5 + $0x670] sm:$0xff] }
  0x8d   :  { %v1472_v2 = vpack.c.bf16 %v253_v61, %v249_v60  ;;  %v287_v48 = vld [vmem:[#allocation5 + $0x678] sm:$0xff]  ;;  %v289_v57 = vld [vmem:[#allocation5 + $0x688] sm:$0xff]  ;;  %v312_v36 = vld [vmem:[#allocation5 + $0x740] sm:$0xff] }
  0x8e   :  { %1451 = vmatpush1.bf16.msra.mxu0 %v1450_v3  ;;  %v248_v3 = vld [vmem:[#allocation5 + $0x540] sm:$0xff]  ;;  %v1684_v55 = vpack.c.bf16 %v287_v48, %v283_v47  ;;  %v291_v59 = vld [vmem:[#allocation5 + $0x698] sm:$0xff] }
  0x8f   :  { %1647 = vmatpush1.bf16.msra.mxu1 %v1646_v4  ;;  %1453 = vmatprep.subr.bf16.mxu0 %v1452_v5  ;;  %v252_v4 = vld [vmem:[#allocation5 + $0x560] sm:$0xff]  ;;  %v250_v5 = vld [vmem:[#allocation5 + $0x550] sm:$0xff]  ;;  %v295_v60 = vld [vmem:[#allocation5 + $0x6b8] sm:$0xff] }
  0x90   :  { %1649 = vmatprep.subr.bf16.mxu1 %v1648_v9  ;;  %v261_v9 = vld [vmem:[#allocation5 + $0x5a8] sm:$0xff]  ;;  %v1474_v12 = vpack.c.bf16 %v252_v4, %v248_v3  ;;  %v1670_v15 = vpack.c.bf16 %v254_v7, %v250_v5  ;;  %v1688_v3 = vpack.c.bf16 %v295_v60, %v291_v59  ;;  %v294_v4 = vld [vmem:[#allocation5 + $0x6b0] sm:$0xff]  ;;  %v299_v7 = vld [vmem:[#allocation5 + $0x6d8] sm:$0xff] }
  0x91   :  { %583 = vmatmul.mubr.f32.vlgmr.msra.gmra.mrb[0].mxu0 %v1886_v13  ;;  %v297_v5 = vld [vmem:[#allocation5 + $0x6c8] sm:$0xff]  ;;  %v307_v19 = vld [vmem:[#allocation5 + $0x718] sm:$0xff]  ;;  %v320_v48 = vld [vmem:[#allocation5 + $0x780] sm:$0xff] }
  0x92   :  { %1455 = vmatpush1.bf16.msra.mxu0 %v1454_v16  ;;  %867 = vmatmul.mubr.f32.vlgmr.msra.gmra.mrb[0].mxu1 %v1886_v13  ;;  %v256_v13 = vld [vmem:[#allocation5 + $0x580] sm:$0xff]  ;;  %v1476_v16 = vpack.c.bf16 %v261_v9, %v257_v8  ;;  %v303_v8 = vld [vmem:[#allocation5 + $0x6f8] sm:$0xff] }
  0x93   :  { %1651 = vmatpush1.bf16.msra.mxu1 %v1650_v17  ;;  %1457 = vmatprep.subr.bf16.mxu0 %v1456_v18  ;;  %v258_v17 = vld [vmem:[#allocation5 + $0x590] sm:$0xff]  ;;  %v1478_v25 = vpack.c.bf16 %v260_v14, %v256_v13  ;;  %v300_v13 = vld [vmem:[#allocation5 + $0x6e0] sm:$0xff] }
  0x94   :  { %1653 = vmatprep.subr.bf16.mxu1 %v1652_v22  ;;  %v262_v18 = vld [vmem:[#allocation5 + $0x5b0] sm:$0xff]  ;;  %v267_v22 = vld [vmem:[#allocation5 + $0x5d8] sm:$0xff]  ;;  %653 = vmatprep.mubr.f32.mxu0 %v1891_v24  ;;  %v328_v60 = vld [vmem:[#allocation5 + $0x7c0] sm:$0xff] }
  0x95   :  { %v1674_v26 = vpack.c.bf16 %v262_v18, %v258_v17  ;;  %v1676_v31 = vpack.c.bf16 %v271_v23, %v267_v22  ;;  %937 = vmatprep.mubr.f32.mxu1 %v1891_v24  ;;  %v298_v14 = vld [vmem:[#allocation5 + $0x6d0] sm:$0xff]  ;;  %v305_v17 = vld [vmem:[#allocation5 + $0x708] sm:$0xff]  ;;  %v304_v24 = vld [vmem:[#allocation5 + $0x700] sm:$0xff] }
  0x96   :  { %1459 = vmatpush1.bf16.msra.mxu0 %v1458_v28  ;;  %v264_v28 = vld [vmem:[#allocation5 + $0x5c0] sm:$0xff]  ;;  %v309_v18 = vld [vmem:[#allocation5 + $0x728] sm:$0xff] }
  0x97   :  { %1655 = vmatpush1.bf16.msra.mxu1 %v1654_v29  ;;  %1461 = vmatprep.subr.bf16.mxu0 %v1460_v30  ;;  %v268_v29 = vld [vmem:[#allocation5 + $0x5e0] sm:$0xff]  ;;  %v266_v30 = vld [vmem:[#allocation5 + $0x5d0] sm:$0xff]  ;;  %v1500_v23 = vpack.c.bf16 %v309_v18, %v305_v17  ;;  %v351_v17 = vld [vmem:[#allocation5 + $0x878] sm:$0xff] }
  0x98   :  { %1657 = vmatprep.subr.bf16.mxu1 %v1656_v34  ;;  %v277_v34 = vld [vmem:[#allocation5 + $0x628] sm:$0xff]  ;;  %v1482_v37 = vpack.c.bf16 %v268_v29, %v264_v28  ;;  %v1678_v38 = vpack.c.bf16 %v270_v32, %v266_v30  ;;  %v310_v28 = vld [vmem:[#allocation5 + $0x730] sm:$0xff]  ;;  %v319_v32 = vld [vmem:[#allocation5 + $0x778] sm:$0xff] }
  0x99   :  { %v1484_v39 = vpack.c.bf16 %v277_v34, %v273_v33  ;;  %v313_v29 = vld [vmem:[#allocation5 + $0x748] sm:$0xff] }
  0x9a   :  { %1463 = vmatpush1.bf16.msra.mxu0 %v1462_v40  ;;  %v272_v40 = vld [vmem:[#allocation5 + $0x600] sm:$0xff]  ;;  %v317_v30 = vld [vmem:[#allocation5 + $0x768] sm:$0xff] }
  0x9b   :  { %1659 = vmatpush1.bf16.msra.mxu1 %v1658_v41  ;;  %1465 = vmatprep.subr.bf16.mxu0 %v1464_v42  ;;  %v276_v41 = vld [vmem:[#allocation5 + $0x620] sm:$0xff]  ;;  %v274_v42 = vld [vmem:[#allocation5 + $0x610] sm:$0xff]  ;;  %v1504_v35 = vpack.c.bf16 %v317_v30, %v313_v29  ;;  %v359_v29 = vld [vmem:[#allocation5 + $0x8b8] sm:$0xff] }
  0x9c   :  { %1661 = vmatprep.subr.bf16.mxu1 %v1660_v46  ;;  %v285_v46 = vld [vmem:[#allocation5 + $0x668] sm:$0xff]  ;;  %v1486_v49 = vpack.c.bf16 %v276_v41, %v272_v40  ;;  %v1682_v50 = vpack.c.bf16 %v278_v44, %v274_v42  ;;  %v318_v40 = vld [vmem:[#allocation5 + $0x770] sm:$0xff]  ;;  %v327_v44 = vld [vmem:[#allocation5 + $0x7b8] sm:$0xff] }
  0x9d   :  { %v1488_v51 = vpack.c.bf16 %v285_v46, %v281_v45  ;;  %v321_v41 = vld [vmem:[#allocation5 + $0x788] sm:$0xff]  ;;  %v1894_v30 = vld [vmem:[#allocation2 + $0x14] ss:$28 sps:$4 sm:$0xff]  }
  0x9e   :  { %1467 = vmatpush1.bf16.msra.mxu0 %v1466_v52  ;;  %v280_v52 = vld [vmem:[#allocation5 + $0x640] sm:$0xff]  ;;  %v325_v42 = vld [vmem:[#allocation5 + $0x7a8] sm:$0xff] }
  0x9f   :  { %1663 = vmatpush1.bf16.msra.mxu1 %v1662_v53  ;;  %1469 = vmatprep.subr.bf16.mxu0 %v1468_v54  ;;  %v284_v53 = vld [vmem:[#allocation5 + $0x660] sm:$0xff]  ;;  %v282_v54 = vld [vmem:[#allocation5 + $0x650] sm:$0xff]  ;;  %v1508_v47 = vpack.c.bf16 %v325_v42, %v321_v41  ;;  %v363_v41 = vld [vmem:[#allocation5 + $0x8d8] sm:$0xff] }
  0xa0   :  { %1665 = vmatprep.subr.bf16.mxu1 %v1664_v58  ;;  %v293_v58 = vld [vmem:[#allocation5 + $0x6a8] sm:$0xff]  ;;  %v1490_v61 = vpack.c.bf16 %v284_v53, %v280_v52  ;;  %v1686_v62 = vpack.c.bf16 %v286_v56, %v282_v54  ;;  %v326_v52 = vld [vmem:[#allocation5 + $0x7b0] sm:$0xff]  ;;  %v335_v56 = vld [vmem:[#allocation5 + $0x7f8] sm:$0xff] }
  0xa1   :  { %v1492_v63 = vpack.c.bf16 %v293_v58, %v289_v57  ;;  %v329_v53 = vld [vmem:[#allocation5 + $0x7c8] sm:$0xff]  ;;  %v367_v42 = vld [vmem:[#allocation5 + $0x8f8] sm:$0xff] }
  0xa2   :  { %1471 = vmatpush1.bf16.msra.mxu0 %v1470_v0  ;;  %v288_v0 = vld [vmem:[#allocation5 + $0x680] sm:$0xff]  ;;  %v333_v54 = vld [vmem:[#allocation5 + $0x7e8] sm:$0xff] }
  0xa3   :  { %1667 = vmatpush1.bf16.msra.mxu1 %v1666_v1  ;;  %1473 = vmatprep.subr.bf16.mxu0 %v1472_v2  ;;  %v292_v1 = vld [vmem:[#allocation5 + $0x6a0] sm:$0xff]  ;;  %v290_v2 = vld [vmem:[#allocation5 + $0x690] sm:$0xff]  ;;  %v1512_v59 = vpack.c.bf16 %v333_v54, %v329_v53  ;;  %v371_v53 = vld [vmem:[#allocation5 + $0x918] sm:$0xff] }
  0xa4   :  { %1669 = vmatprep.subr.bf16.mxu1 %v1668_v6  ;;  %v301_v6 = vld [vmem:[#allocation5 + $0x6e8] sm:$0xff]  ;;  %v1494_v9 = vpack.c.bf16 %v292_v1, %v288_v0  ;;  %v1690_v10 = vpack.c.bf16 %v294_v4, %v290_v2  ;;  %v334_v0 = vld [vmem:[#allocation5 + $0x7f0] sm:$0xff]  ;;  %v343_v4 = vld [vmem:[#allocation5 + $0x838] sm:$0xff] }
  0xa5   :  { %v1496_v11 = vpack.c.bf16 %v301_v6, %v297_v5  ;;  %v337_v1 = vld [vmem:[#allocation5 + $0x808] sm:$0xff]  ;;  %v375_v54 = vld [vmem:[#allocation5 + $0x938] sm:$0xff] }
  0xa6   :  { %1475 = vmatpush1.bf16.msra.mxu0 %v1474_v12  ;;  %v296_v12 = vld [vmem:[#allocation5 + $0x6c0] sm:$0xff]  ;;  %v341_v2 = vld [vmem:[#allocation5 + $0x828] sm:$0xff] }
  0xa7   :  { %1671 = vmatpush1.bf16.msra.mxu1 %v1670_v15  ;;  %1477 = vmatprep.subr.bf16.mxu0 %v1476_v16  ;;  %v1692_v15 = vpack.c.bf16 %v303_v8, %v299_v7  ;;  %v302_v16 = vld [vmem:[#allocation5 + $0x6f0] sm:$0xff]  ;;  %v1498_v21 = vpack.c.bf16 %v300_v13, %v296_v12  ;;  %v1516_v7 = vpack.c.bf16 %v341_v2, %v337_v1  ;;  %v336_v8 = vld [vmem:[#allocation5 + $0x800] sm:$0xff]  ;;  %v345_v13 = vld [vmem:[#allocation5 + $0x848] sm:$0xff] }
  0xa8   :  { %1673 = vmatprep.subr.bf16.mxu1 %v1672_v20  ;;  %v311_v20 = vld [vmem:[#allocation5 + $0x738] sm:$0xff]  ;;  %v1694_v22 = vpack.c.bf16 %v302_v16, %v298_v14  ;;  %v342_v12 = vld [vmem:[#allocation5 + $0x830] sm:$0xff]  ;;  %v349_v14 = vld [vmem:[#allocation5 + $0x868] sm:$0xff] }
  0xa9   :  { %v347_v16 = vld [vmem:[#allocation5 + $0x858] sm:$0xff] }
  0xaa   :  { %1479 = vmatpush1.bf16.msra.mxu0 %v1478_v25  ;;  %v308_v25 = vld [vmem:[#allocation5 + $0x720] sm:$0xff]  ;;  %v379_v1 = vld [vmem:[#allocation5 + $0x958] sm:$0xff] }
  0xab   :  { %1675 = vmatpush1.bf16.msra.mxu1 %v1674_v26  ;;  %1481 = vmatprep.subr.bf16.mxu0 %v1480_v27  ;;  %v306_v26 = vld [vmem:[#allocation5 + $0x710] sm:$0xff]  ;;  %v1696_v27 = vpack.c.bf16 %v311_v20, %v307_v19  ;;  %v1502_v33 = vpack.c.bf16 %v308_v25, %v304_v24  ;;  %v344_v19 = vld [vmem:[#allocation5 + $0x840] sm:$0xff]  ;;  %v353_v25 = vld [vmem:[#allocation5 + $0x888] sm:$0xff] }
  0xac   :  { %1677 = vmatprep.subr.bf16.mxu1 %v1676_v31  ;;  %v315_v31 = vld [vmem:[#allocation5 + $0x758] sm:$0xff]  ;;  %v1698_v34 = vpack.c.bf16 %v310_v28, %v306_v26  ;;  %v348_v20 = vld [vmem:[#allocation5 + $0x860] sm:$0xff]  ;;  %v350_v24 = vld [vmem:[#allocation5 + $0x870] sm:$0xff]  ;;  %v1716_v26 = vpack.c.bf16 %v351_v17, %v347_v16 }
  0xad   :  { %v355_v28 = vld [vmem:[#allocation5 + $0x898] sm:$0xff] }
  0xae   :  { %1483 = vmatpush1.bf16.msra.mxu0 %v1482_v37  ;;  %v316_v37 = vld [vmem:[#allocation5 + $0x760] sm:$0xff]  ;;  %v383_v2 = vld [vmem:[#allocation5 + $0x978] sm:$0xff] }
  0xaf   :  { %1679 = vmatpush1.bf16.msra.mxu1 %v1678_v38  ;;  %1485 = vmatprep.subr.bf16.mxu0 %v1484_v39  ;;  %v314_v38 = vld [vmem:[#allocation5 + $0x750] sm:$0xff]  ;;  %v1700_v39 = vpack.c.bf16 %v319_v32, %v315_v31  ;;  %v1506_v45 = vpack.c.bf16 %v316_v37, %v312_v36  ;;  %v1522_v31 = vpack.c.bf16 %v348_v20, %v344_v19  ;;  %v352_v32 = vld [vmem:[#allocation5 + $0x880] sm:$0xff] }
  0xb0   :  { %1681 = vmatprep.subr.bf16.mxu1 %v1680_v43  ;;  %v323_v43 = vld [vmem:[#allocation5 + $0x798] sm:$0xff]  ;;  %v1702_v46 = vpack.c.bf16 %v318_v40, %v314_v38  ;;  %v354_v36 = vld [vmem:[#allocation5 + $0x890] sm:$0xff]  ;;  %v1720_v37 = vpack.c.bf16 %v359_v29, %v355_v28  ;;  %v365_v40 = vld [vmem:[#allocation5 + $0x8e8] sm:$0xff] }
  0xb1   :  { %v358_v38 = vld [vmem:[#allocation5 + $0x8b0] sm:$0xff]  ;;  %v388_v19 = vld [vmem:[#allocation5 + $0x9a0] sm:$0xff] }
  0xb2   :  { %1487 = vmatpush1.bf16.msra.mxu0 %v1486_v49  ;;  %v324_v49 = vld [vmem:[#allocation5 + $0x7a0] sm:$0xff]  ;;  %v386_v20 = vld [vmem:[#allocation5 + $0x990] sm:$0xff] }
  0xb3   :  { %1683 = vmatpush1.bf16.msra.mxu1 %v1682_v50  ;;  %1489 = vmatprep.subr.bf16.mxu0 %v1488_v51  ;;  %v322_v50 = vld [vmem:[#allocation5 + $0x790] sm:$0xff]  ;;  %v1704_v51 = vpack.c.bf16 %v327_v44, %v323_v43  ;;  %v1510_v57 = vpack.c.bf16 %v324_v49, %v320_v48  ;;  %v1722_v44 = vpack.c.bf16 %v358_v38, %v354_v36  ;;  %v405_v36 = vld [vmem:[#allocation5 + $0xa28] sm:$0xff]  ;;  %v407_v38 = vld [vmem:[#allocation5 + $0xa38] sm:$0xff] }
  0xb4   :  { %1685 = vmatprep.subr.bf16.mxu1 %v1684_v55  ;;  %v331_v55 = vld [vmem:[#allocation5 + $0x7d8] sm:$0xff]  ;;  %v1706_v58 = vpack.c.bf16 %v326_v52, %v322_v50  ;;  %v362_v48 = vld [vmem:[#allocation5 + $0x8d0] sm:$0xff]  ;;  %v1724_v49 = vpack.c.bf16 %v367_v42, %v363_v41  ;;  %v373_v52 = vld [vmem:[#allocation5 + $0x928] sm:$0xff] }
  0xb5   :  { %v366_v50 = vld [vmem:[#allocation5 + $0x8f0] sm:$0xff]  ;;  %v400_v42 = vld [vmem:[#allocation5 + $0xa00] sm:$0xff] }
  0xb6   :  { %1491 = vmatpush1.bf16.msra.mxu0 %v1490_v61  ;;  %v332_v61 = vld [vmem:[#allocation5 + $0x7e0] sm:$0xff] }
  0xb7   :  { %1687 = vmatpush1.bf16.msra.mxu1 %v1686_v62  ;;  %1493 = vmatprep.subr.bf16.mxu0 %v1492_v63  ;;  %v330_v62 = vld [vmem:[#allocation5 + $0x7d0] sm:$0xff]  ;;  %v1708_v63 = vpack.c.bf16 %v335_v56, %v331_v55  ;;  %v1514_v5 = vpack.c.bf16 %v332_v61, %v328_v60  ;;  %v1726_v56 = vpack.c.bf16 %v366_v50, %v362_v48  ;;  %v413_v48 = vld [vmem:[#allocation5 + $0xa68] sm:$0xff]  ;;  %v415_v50 = vld [vmem:[#allocation5 + $0xa78] sm:$0xff] }
  0xb8   :  { %1689 = vmatprep.subr.bf16.mxu1 %v1688_v3  ;;  %v339_v3 = vld [vmem:[#allocation5 + $0x818] sm:$0xff]  ;;  %v1710_v6 = vpack.c.bf16 %v334_v0, %v330_v62  ;;  %v370_v60 = vld [vmem:[#allocation5 + $0x910] sm:$0xff]  ;;  %v1728_v61 = vpack.c.bf16 %v375_v54, %v371_v53  ;;  %v381_v0 = vld [vmem:[#allocation5 + $0x968] sm:$0xff] }
  0xb9   :  { %v374_v62 = vld [vmem:[#allocation5 + $0x930] sm:$0xff]  ;;  %v408_v54 = vld [vmem:[#allocation5 + $0xa40] sm:$0xff] }
  0xba   :  { %1495 = vmatpush1.bf16.msra.mxu0 %v1494_v9  ;;  %v340_v9 = vld [vmem:[#allocation5 + $0x820] sm:$0xff] }
  0xbb   :  { %1691 = vmatpush1.bf16.msra.mxu1 %v1690_v10  ;;  %1497 = vmatprep.subr.bf16.mxu0 %v1496_v11  ;;  %v338_v10 = vld [vmem:[#allocation5 + $0x810] sm:$0xff]  ;;  %v1712_v11 = vpack.c.bf16 %v343_v4, %v339_v3  ;;  %v1518_v18 = vpack.c.bf16 %v340_v9, %v336_v8  ;;  %v1730_v4 = vpack.c.bf16 %v374_v62, %v370_v60  ;;  %v421_v60 = vld [vmem:[#allocation5 + $0xaa8] sm:$0xff]  ;;  %v423_v62 = vld [vmem:[#allocation5 + $0xab8] sm:$0xff] }
  0xbc   :  { %1693 = vmatprep.subr.bf16.mxu1 %v1692_v15  ;;  %v1889_v15 = vld [vmem:[#allocation2 + $0x8] ss:$28 sps:$4 sm:$0xff]   ;;  %v1732_v9 = vpack.c.bf16 %v383_v2, %v379_v1  ;;  %v416_v2 = vld [vmem:[#allocation5 + $0xa80] sm:$0xff] }
  0xbd   :  { %v378_v8 = vld [vmem:[#allocation5 + $0x950] sm:$0xff] }
  0xbe   :  { %1499 = vmatpush1.bf16.msra.mxu0 %v1498_v21  ;;  %v1714_v21 = vpack.c.bf16 %v342_v12, %v338_v10  ;;  %v382_v10 = vld [vmem:[#allocation5 + $0x970] sm:$0xff]  ;;  %v389_v12 = vld [vmem:[#allocation5 + $0x9a8] sm:$0xff] }
  0xbf   :  { %1695 = vmatpush1.bf16.msra.mxu1 %v1694_v22  ;;  %1501 = vmatprep.subr.bf16.mxu0 %v1500_v23  ;;  %v1520_v22 = vpack.c.bf16 %v349_v14, %v345_v13  ;;  %v346_v23 = vld [vmem:[#allocation5 + $0x850] sm:$0xff]  ;;  %v387_v13 = vld [vmem:[#allocation5 + $0x998] sm:$0xff]  ;;  %v1734_v16 = vpack.c.bf16 %v382_v10, %v378_v8  ;;  %v429_v8 = vld [vmem:[#allocation5 + $0xae8] sm:$0xff] }
  0xc0   :  { %1697 = vmatprep.subr.bf16.mxu1 %v1696_v27  ;;  %v357_v27 = vld [vmem:[#allocation5 + $0x8a8] sm:$0xff]  ;;  %v391_v14 = vld [vmem:[#allocation5 + $0x9b8] sm:$0xff] }
  0xc1   :  { %v431_v10 = vld [vmem:[#allocation5 + $0xaf8] sm:$0xff] }
  0xc2   :  { %1503 = vmatpush1.bf16.msra.mxu0 %v1502_v33  ;;  %v356_v33 = vld [vmem:[#allocation5 + $0x8a0] sm:$0xff] }
  0xc3   :  { %1699 = vmatpush1.bf16.msra.mxu1 %v1698_v34  ;;  %1505 = vmatprep.subr.bf16.mxu0 %v1504_v35  ;;  %v1718_v34 = vpack.c.bf16 %v350_v24, %v346_v23  ;;  %v1524_v35 = vpack.c.bf16 %v357_v27, %v353_v25  ;;  %v1526_v43 = vpack.c.bf16 %v356_v33, %v352_v32  ;;  %v393_v23 = vld [vmem:[#allocation5 + $0x9c8] sm:$0xff]  ;;  %v395_v25 = vld [vmem:[#allocation5 + $0x9d8] sm:$0xff]  ;;  %v394_v32 = vld [vmem:[#allocation5 + $0x9d0] sm:$0xff] }
  0xc4   :  { %1701 = vmatprep.subr.bf16.mxu1 %v1700_v39  ;;  %v361_v39 = vld [vmem:[#allocation5 + $0x8c8] sm:$0xff] }
  0xc5   :  { %v397_v24 = vld [vmem:[#allocation5 + $0x9e8] sm:$0xff] }
  0xc6   :  { %1507 = vmatpush1.bf16.msra.mxu0 %v1506_v45  ;;  %v1528_v45 = vpack.c.bf16 %v365_v40, %v361_v39  ;;  %v1544_v29 = vpack.c.bf16 %v397_v24, %v393_v23 }
  0xc7   :  { %1703 = vmatpush1.bf16.msra.mxu1 %v1702_v46  ;;  %1509 = vmatprep.subr.bf16.mxu0 %v1508_v47  ;;  %v360_v46 = vld [vmem:[#allocation5 + $0x8c0] sm:$0xff] }
  0xc8   :  { %1705 = vmatprep.subr.bf16.mxu1 %v1704_v51  ;;  %v364_v47 = vld [vmem:[#allocation5 + $0x8e0] sm:$0xff]  ;;  %v369_v51 = vld [vmem:[#allocation5 + $0x908] sm:$0xff] }
  0xc9   :  { %v1530_v55 = vpack.c.bf16 %v364_v47, %v360_v46  ;;  %v406_v46 = vld [vmem:[#allocation5 + $0xa30] sm:$0xff]  ;;  %v409_v47 = vld [vmem:[#allocation5 + $0xa48] sm:$0xff] }
  0xca   :  { %1511 = vmatpush1.bf16.msra.mxu0 %v1510_v57  ;;  %v1532_v57 = vpack.c.bf16 %v373_v52, %v369_v51  ;;  %v1552_v53 = vpack.c.bf16 %v413_v48, %v409_v47 }
  0xcb   :  { %1707 = vmatpush1.bf16.msra.mxu1 %v1706_v58  ;;  %1513 = vmatprep.subr.bf16.mxu0 %v1512_v59  ;;  %v368_v58 = vld [vmem:[#allocation5 + $0x900] sm:$0xff] }
  0xcc   :  { %1709 = vmatprep.subr.bf16.mxu1 %v1708_v63  ;;  %v372_v59 = vld [vmem:[#allocation5 + $0x920] sm:$0xff]  ;;  %v377_v63 = vld [vmem:[#allocation5 + $0x948] sm:$0xff] }
  0xcd   :  { %v1534_v3 = vpack.c.bf16 %v372_v59, %v368_v58  ;;  %v414_v58 = vld [vmem:[#allocation5 + $0xa70] sm:$0xff]  ;;  %v417_v59 = vld [vmem:[#allocation5 + $0xa88] sm:$0xff] }
  0xce   :  { %1515 = vmatpush1.bf16.msra.mxu0 %v1514_v5  ;;  %v1536_v5 = vpack.c.bf16 %v381_v0, %v377_v63  ;;  %v1556_v1 = vpack.c.bf16 %v421_v60, %v417_v59 }
  0xcf   :  { %1711 = vmatpush1.bf16.msra.mxu1 %v1710_v6  ;;  %1517 = vmatprep.subr.bf16.mxu0 %v1516_v7  ;;  %v376_v6 = vld [vmem:[#allocation5 + $0x940] sm:$0xff] }
  0xd0   :  { %1713 = vmatprep.subr.bf16.mxu1 %v1712_v11  ;;  %v380_v7 = vld [vmem:[#allocation5 + $0x960] sm:$0xff]  ;;  %v385_v11 = vld [vmem:[#allocation5 + $0x988] sm:$0xff] }
  0xd1   :  { %654 = vmatmul.mubr.f32.vlgmr.msra.gmra.mrb[0].mxu0 %v1889_v15  ;;  %v1540_v17 = vpack.c.bf16 %v389_v12, %v385_v11 }
  0xd2   :  { %1519 = vmatpush1.bf16.msra.mxu0 %v1518_v18  ;;  %938 = vmatmul.mubr.f32.vlgmr.msra.gmra.mrb[0].mxu1 %v1889_v15  ;;  %v1538_v15 = vpack.c.bf16 %v380_v7, %v376_v6  ;;  %v384_v18 = vld [vmem:[#allocation5 + $0x980] sm:$0xff]  ;;  %v422_v6 = vld [vmem:[#allocation5 + $0xab0] sm:$0xff]  ;;  %v425_v7 = vld [vmem:[#allocation5 + $0xac8] sm:$0xff] }
  0xd3   :  { %1715 = vmatpush1.bf16.msra.mxu1 %v1714_v21  ;;  %1521 = vmatprep.subr.bf16.mxu0 %v1520_v22  ;;  %v1736_v21 = vpack.c.bf16 %v391_v14, %v387_v13  ;;  %v390_v22 = vld [vmem:[#allocation5 + $0x9b0] sm:$0xff]  ;;  %v1542_v27 = vpack.c.bf16 %v388_v19, %v384_v18  ;;  %v1560_v13 = vpack.c.bf16 %v429_v8, %v425_v7  ;;  %v424_v14 = vld [vmem:[#allocation5 + $0xac0] sm:$0xff]  ;;  %v433_v19 = vld [vmem:[#allocation5 + $0xb08] sm:$0xff] }
  0xd4   :  { %1717 = vmatprep.subr.bf16.mxu1 %v1716_v26  ;;  %724 = vmatprep.mubr.f32.mxu0 %v1894_v30  ;;  %v399_v26 = vld [vmem:[#allocation5 + $0x9f8] sm:$0xff]  ;;  %v1738_v28 = vpack.c.bf16 %v390_v22, %v386_v20  ;;  %v430_v18 = vld [vmem:[#allocation5 + $0xaf0] sm:$0xff]  ;;  %v437_v20 = vld [vmem:[#allocation5 + $0xb28] sm:$0xff] }
  0xd5   :  { %1008 = vmatprep.mubr.f32.mxu1 %v1894_v30  ;;  %v392_v30 = vld [vmem:[#allocation5 + $0x9c0] sm:$0xff]  ;;  %v1740_v33 = vpack.c.bf16 %v399_v26, %v395_v25  ;;  %v439_v22 = vld [vmem:[#allocation5 + $0xb38] sm:$0xff]  ;;  %v1564_v25 = vpack.c.bf16 %v437_v20, %v433_v19 }
  0xd6   :  { %1523 = vmatpush1.bf16.msra.mxu0 %v1522_v31  ;;  %v396_v31 = vld [vmem:[#allocation5 + $0x9e0] sm:$0xff]  ;;  %v1124_v19 = vld [vmem:[%s2341_s3 + $0x110] sm:$0xff] }
  0xd7   :  { %1719 = vmatpush1.bf16.msra.mxu1 %v1718_v34  ;;  %1525 = vmatprep.subr.bf16.mxu0 %v1524_v35  ;;  %v398_v34 = vld [vmem:[#allocation5 + $0x9f0] sm:$0xff]  ;;  %v401_v35 = vld [vmem:[#allocation5 + $0xa08] sm:$0xff]  ;;  %v1546_v39 = vpack.c.bf16 %v396_v31, %v392_v30  ;;  %v432_v26 = vld [vmem:[#allocation5 + $0xb00] sm:$0xff] }
  0xd8   :  { %1721 = vmatprep.subr.bf16.mxu1 %v1720_v37  ;;  %v403_v37 = vld [vmem:[#allocation5 + $0xa18] sm:$0xff]  ;;  %v1742_v40 = vpack.c.bf16 %v398_v34, %v394_v32  ;;  %v1548_v41 = vpack.c.bf16 %v405_v36, %v401_v35  ;;  %v438_v30 = vld [vmem:[#allocation5 + $0xb30] sm:$0xff]  ;;  %v441_v31 = vld [vmem:[#allocation5 + $0xb48] sm:$0xff] }
  0xd9   :  { %v445_v32 = vld [vmem:[#allocation5 + $0xb68] sm:$0xff]  ;;  %v447_v34 = vld [vmem:[#allocation5 + $0xb78] sm:$0xff]  ;;  %v464_v8 = vld [vmem:[#allocation5 + $0xc00] sm:$0xff] }
  0xda   :  { %1527 = vmatpush1.bf16.msra.mxu0 %v1526_v43  ;;  %v404_v43 = vld [vmem:[#allocation5 + $0xa20] sm:$0xff] }
  0xdb   :  { %1723 = vmatpush1.bf16.msra.mxu1 %v1722_v44  ;;  %1529 = vmatprep.subr.bf16.mxu0 %v1528_v45  ;;  %v402_v44 = vld [vmem:[#allocation5 + $0xa10] sm:$0xff]  ;;  %v1744_v45 = vpack.c.bf16 %v407_v38, %v403_v37  ;;  %v1550_v51 = vpack.c.bf16 %v404_v43, %v400_v42  ;;  %v1568_v37 = vpack.c.bf16 %v445_v32, %v441_v31  ;;  %v440_v38 = vld [vmem:[#allocation5 + $0xb40] sm:$0xff]  ;;  %v449_v43 = vld [vmem:[#allocation5 + $0xb88] sm:$0xff] }
  0xdc   :  { %1725 = vmatprep.subr.bf16.mxu1 %v1724_v49  ;;  %v411_v49 = vld [vmem:[#allocation5 + $0xa58] sm:$0xff]  ;;  %v1746_v52 = vpack.c.bf16 %v406_v46, %v402_v44  ;;  %v446_v42 = vld [vmem:[#allocation5 + $0xb70] sm:$0xff]  ;;  %v453_v44 = vld [vmem:[#allocation5 + $0xba8] sm:$0xff] }
  0xdd   :  { %v455_v46 = vld [vmem:[#allocation5 + $0xbb8] sm:$0xff]  ;;  %v1125_v20 = vld [vmem:[%s2341_s3 + $0x118] sm:$0xff]  ;;  %v1090_v32 = vld [vmem:[%s2341_s3] sm:$0xff] }
  0xde   :  { %1531 = vmatpush1.bf16.msra.mxu0 %v1530_v55  ;;  %v412_v55 = vld [vmem:[#allocation5 + $0xa60] sm:$0xff] }
  0xdf   :  { %1727 = vmatpush1.bf16.msra.mxu1 %v1726_v56  ;;  %1533 = vmatprep.subr.bf16.mxu0 %v1532_v57  ;;  %v410_v56 = vld [vmem:[#allocation5 + $0xa50] sm:$0xff]  ;;  %v1748_v57 = vpack.c.bf16 %v415_v50, %v411_v49  ;;  %v1554_v63 = vpack.c.bf16 %v412_v55, %v408_v54  ;;  %v1572_v49 = vpack.c.bf16 %v453_v44, %v449_v43  ;;  %v448_v50 = vld [vmem:[#allocation5 + $0xb80] sm:$0xff]  ;;  %v457_v55 = vld [vmem:[#allocation5 + $0xbc8] sm:$0xff] }
  0xe0   :  { %1729 = vmatprep.subr.bf16.mxu1 %v1728_v61  ;;  %v419_v61 = vld [vmem:[#allocation5 + $0xa98] sm:$0xff]  ;;  %v1750_v0 = vpack.c.bf16 %v414_v58, %v410_v56  ;;  %v454_v54 = vld [vmem:[#allocation5 + $0xbb0] sm:$0xff]  ;;  %v461_v56 = vld [vmem:[#allocation5 + $0xbe8] sm:$0xff] }
  0xe1   :  { %v463_v58 = vld [vmem:[#allocation5 + $0xbf8] sm:$0xff]  ;;  %v1130_v44 = vld [vmem:[%s2341_s3 + $0x140] sm:$0xff] }
  0xe2   :  { %1535 = vmatpush1.bf16.msra.mxu0 %v1534_v3  ;;  %v420_v3 = vld [vmem:[#allocation5 + $0xaa0] sm:$0xff] }
  0xe3   :  { %1731 = vmatpush1.bf16.msra.mxu1 %v1730_v4  ;;  %1537 = vmatprep.subr.bf16.mxu0 %v1536_v5  ;;  %v418_v4 = vld [vmem:[#allocation5 + $0xa90] sm:$0xff]  ;;  %v1752_v5 = vpack.c.bf16 %v423_v62, %v419_v61  ;;  %v1558_v11 = vpack.c.bf16 %v420_v3, %v416_v2  ;;  %v1576_v61 = vpack.c.bf16 %v461_v56, %v457_v55  ;;  %v456_v62 = vld [vmem:[#allocation5 + $0xbc0] sm:$0xff]  ;;  %v465_v3 = vld [vmem:[#allocation5 + $0xc08] sm:$0xff] }
  0xe4   :  { %1733 = vmatprep.subr.bf16.mxu1 %v1732_v9  ;;  %v427_v9 = vld [vmem:[#allocation5 + $0xad8] sm:$0xff]  ;;  %v1754_v12 = vpack.c.bf16 %v422_v6, %v418_v4  ;;  %v462_v2 = vld [vmem:[#allocation5 + $0xbf0] sm:$0xff]  ;;  %v469_v4 = vld [vmem:[#allocation5 + $0xc28] sm:$0xff] }
  0xe5   :  { %v1580_v7 = vpack.c.bf16 %v469_v4, %v465_v3  ;;  %v1137_v55 = vld [vmem:[%s2341_s3 + $0x178] sm:$0xff] }
  0xe6   :  { %1539 = vmatpush1.bf16.msra.mxu0 %v1538_v15  ;;  %v428_v15 = vld [vmem:[#allocation5 + $0xae0] sm:$0xff] }
  0xe7   :  { %1735 = vmatpush1.bf16.msra.mxu1 %v1734_v16  ;;  %1541 = vmatprep.subr.bf16.mxu0 %v1540_v17  ;;  %v426_v16 = vld [vmem:[#allocation5 + $0xad0] sm:$0xff]  ;;  %v1756_v17 = vpack.c.bf16 %v431_v10, %v427_v9  ;;  %v1562_v23 = vpack.c.bf16 %v428_v15, %v424_v14  ;;  %v468_v9 = vld [vmem:[#allocation5 + $0xc20] sm:$0xff]  ;;  %v467_v10 = vld [vmem:[#allocation5 + $0xc18] sm:$0xff] }
  0xe8   :  { %1737 = vmatprep.subr.bf16.mxu1 %v1736_v21  ;;  %v435_v21 = vld [vmem:[#allocation5 + $0xb18] sm:$0xff]  ;;  %v1758_v24 = vpack.c.bf16 %v430_v18, %v426_v16  ;;  %v1123_v14 = vld [vmem:[%s2341_s3 + $0x108] sm:$0xff]  ;;  %v1582_v15 = vpack.c.bf16 %v468_v9, %v464_v8  ;;  %v1141_v3 = vld [vmem:[%s2341_s3 + $0x198] sm:$0xff] }
  0xe9   :  { %v1096_v8 = vld [vmem:[%s2341_s3 + $0x30] sm:$0xff]  ;;  %v1097_v9 = vld [vmem:[%s2341_s3 + $0x38] sm:$0xff] }
  0xea   :  { %1543 = vmatpush1.bf16.msra.mxu0 %v1542_v27  ;;  %v436_v27 = vld [vmem:[#allocation5 + $0xb20] sm:$0xff] }
  0xeb   :  { %1739 = vmatpush1.bf16.msra.mxu1 %v1738_v28  ;;  %1545 = vmatprep.subr.bf16.mxu0 %v1544_v29  ;;  %v434_v28 = vld [vmem:[#allocation5 + $0xb10] sm:$0xff]  ;;  %v1760_v29 = vpack.c.bf16 %v439_v22, %v435_v21  ;;  %v1566_v35 = vpack.c.bf16 %v436_v27, %v432_v26  ;;  %v2035_v21 = vmov 0.0   ;;  %v1895_v27 = vld [vmem:[#allocation2 + $0x18] ss:$28 sps:$4 sm:$0xff]  }
  0xec   :  { %1741 = vmatprep.subr.bf16.mxu1 %v1740_v33  ;;  %v443_v33 = vld [vmem:[#allocation5 + $0xb58] sm:$0xff]  ;;  %v1762_v36 = vpack.c.bf16 %v438_v30, %v434_v28  ;;  %v466_v22 = vld [vmem:[#allocation5 + $0xc10] sm:$0xff]  ;;  %v1126_v28 = vld [vmem:[%s2341_s3 + $0x120] sm:$0xff] }
  0xed   :  { %v1107_v26 = vld [vmem:[%s2341_s3 + $0x88] sm:$0xff] }
  0xee   :  { %1547 = vmatpush1.bf16.msra.mxu0 %v1546_v39  ;;  %v444_v39 = vld [vmem:[#allocation5 + $0xb60] sm:$0xff] }
  0xef   :  { %1743 = vmatpush1.bf16.msra.mxu1 %v1742_v40  ;;  %1549 = vmatprep.subr.bf16.mxu0 %v1548_v41  ;;  %v442_v40 = vld [vmem:[#allocation5 + $0xb50] sm:$0xff]  ;;  %v1764_v41 = vpack.c.bf16 %v447_v34, %v443_v33  ;;  %v1570_v47 = vpack.c.bf16 %v444_v39, %v440_v38  ;;  %v1129_v38 = vld [vmem:[%s2341_s3 + $0x138] sm:$0xff] }
  0xf0   :  { %1745 = vmatprep.subr.bf16.mxu1 %v1744_v45  ;;  %v451_v45 = vld [vmem:[#allocation5 + $0xb98] sm:$0xff]  ;;  %v1766_v48 = vpack.c.bf16 %v446_v42, %v442_v40  ;;  %v1091_v33 = vld [vmem:[%s2341_s3 + $0x8] sm:$0xff]  ;;  %v1093_v42 = vld [vmem:[%s2341_s3 + $0x18] sm:$0xff] }
  0xf1   :  { %v1782_v39 = vpack.c.bf16 %v1091_v33, %v1090_v32  ;;  %v1147_v32 = vld [vmem:[%s2341_s3 + $0x1c8] sm:$0xff] }
  0xf2   :  { %1551 = vmatpush1.bf16.msra.mxu0 %v1550_v51  ;;  %v452_v51 = vld [vmem:[#allocation5 + $0xba0] sm:$0xff] }
  0xf3   :  { %1747 = vmatpush1.bf16.msra.mxu1 %v1746_v52  ;;  %1553 = vmatprep.subr.bf16.mxu0 %v1552_v53  ;;  %v450_v52 = vld [vmem:[#allocation5 + $0xb90] sm:$0xff]  ;;  %v1768_v53 = vpack.c.bf16 %v455_v46, %v451_v45  ;;  %v1574_v59 = vpack.c.bf16 %v452_v51, %v448_v50  ;;  %v1134_v51 = vld [vmem:[%s2341_s3 + $0x160] sm:$0xff] }
  0xf4   :  { %1749 = vmatprep.subr.bf16.mxu1 %v1748_v57  ;;  %v459_v57 = vld [vmem:[#allocation5 + $0xbd8] sm:$0xff]  ;;  %v1770_v60 = vpack.c.bf16 %v454_v54, %v450_v52  ;;  %v1131_v45 = vld [vmem:[%s2341_s3 + $0x148] sm:$0xff] }
  0xf5   :  { %v1135_v52 = vld [vmem:[%s2341_s3 + $0x168] sm:$0xff]  ;;  %v1136_v54 = vld [vmem:[%s2341_s3 + $0x170] sm:$0xff] }
  0xf6   :  { %1555 = vmatpush1.bf16.msra.mxu0 %v1554_v63  ;;  %v460_v63 = vld [vmem:[#allocation5 + $0xbe0] sm:$0xff]  ;;  %v1834_v56 = vpack.c.bf16 %v1137_v55, %v1136_v54 }
  0xf7   :  { %1751 = vmatpush1.bf16.msra.mxu1 %v1750_v0  ;;  %1557 = vmatprep.subr.bf16.mxu0 %v1556_v1  ;;  %v458_v0 = vld [vmem:[#allocation5 + $0xbd0] sm:$0xff]  ;;  %v1772_v1 = vpack.c.bf16 %v463_v58, %v459_v57  ;;  %v1138_v57 = vld [vmem:[%s2341_s3 + $0x180] sm:$0xff] }
  0xf8   :  { %1753 = vmatprep.subr.bf16.mxu1 %v1752_v5  ;;  %v1578_v5 = vpack.c.bf16 %v460_v63, %v456_v62  ;;  %v1774_v6 = vpack.c.bf16 %v462_v2, %v458_v0  ;;  %v1139_v58 = vld [vmem:[%s2341_s3 + $0x188] sm:$0xff]  ;;  %v1094_v63 = vld [vmem:[%s2341_s3 + $0x20] sm:$0xff]  ;;  %v1140_v2 = vld [vmem:[%s2341_s3 + $0x190] sm:$0xff] }
  0xf9   :  { %v1095_v0 = vld [vmem:[%s2341_s3 + $0x28] sm:$0xff]  ;;  %v1840_v4 = vpack.c.bf16 %v1141_v3, %v1140_v2 }
  0xfa   :  { %1559 = vmatpush1.bf16.msra.mxu0 %v1558_v11  ;;  %v471_v11 = vld [vmem:[#allocation5 + $0xc38] sm:$0xff] }
  0xfb   :  { %1755 = vmatpush1.bf16.msra.mxu1 %v1754_v12  ;;  %1561 = vmatprep.subr.bf16.mxu0 %v1560_v13  ;;  %v1892_v12 = vld [vmem:[#allocation2 + $0x10] ss:$28 sps:$4 sm:$0xff]   ;;  %v1122_v13 = vld [vmem:[%s2341_s3 + $0x100] sm:$0xff]  ;;  %v1776_v16 = vpack.c.bf16 %v471_v11, %v467_v10  ;;  %v1794_v11 = vpack.c.bf16 %v1097_v9, %v1096_v8 }
  0xfc   :  { %1757 = vmatprep.subr.bf16.mxu1 %v1756_v17  ;;  %v2034_v17 = vmov 0.0|0.0   ;;  %v1813_v18 = vpack.c.bf16 %v1123_v14, %v1122_v13  ;;  %v1142_v10 = vld [vmem:[%s2341_s3 + $0x1a0] sm:$0xff] }
  0xfd   :  { %v1114_v14 = vld [vmem:[%s2341_s3 + $0xc0] sm:$0xff] }
  0xfe   :  { %1563 = vmatpush1.bf16.msra.mxu0 %v1562_v23  ;;  %v470_v23 = vld [vmem:[#allocation5 + $0xc30] sm:$0xff] }
  0xff   :  { %1759 = vmatpush1.bf16.msra.mxu1 %v1758_v24  ;;  %1565 = vmatprep.subr.bf16.mxu0 %v1564_v25  ;;  %v1816_v24 = vpack.c.bf16 %v1125_v20, %v1124_v19  ;;  %v1106_v25 = vld [vmem:[%s2341_s3 + $0x80] sm:$0xff]  ;;  %v1778_v30 = vpack.c.bf16 %v470_v23, %v466_v22  ;;  %v1099_v19 = vld [vmem:[%s2341_s3 + $0x48] sm:$0xff]  ;;  %v1144_v22 = vld [vmem:[%s2341_s3 + $0x1b0] sm:$0xff] }
 0x100   :  { %1761 = vmatprep.subr.bf16.mxu1 %v1760_v29  ;;  %v1127_v29 = vld [vmem:[%s2341_s3 + $0x128] sm:$0xff]  ;;  %v1780_v31 = vpack.c.bf16 %v1107_v26, %v1106_v25  ;;  %v1145_v23 = vld [vmem:[%s2341_s3 + $0x1b8] sm:$0xff]  ;;  %v1116_v25 = vld [vmem:[%s2341_s3 + $0xd0] sm:$0xff] }
 0x101   :  { %v1819_v34 = vpack.c.bf16 %v1127_v29, %v1126_v28  ;;  %v1117_v26 = vld [vmem:[%s2341_s3 + $0xd8] sm:$0xff]  ;;  %v1100_v28 = vld [vmem:[%s2341_s3 + $0x50] sm:$0xff] }
 0x102   :  { %1567 = vmatpush1.bf16.msra.mxu0 %v1566_v35  ;;  %v1108_v35 = vld [vmem:[%s2341_s3 + $0x90] sm:$0xff]  ;;  %v1101_v29 = vld [vmem:[%s2341_s3 + $0x58] sm:$0xff] }
 0x103   :  { %1763 = vmatpush1.bf16.msra.mxu1 %v1762_v36  ;;  %1569 = vmatprep.subr.bf16.mxu0 %v1568_v37  ;;  %v1109_v36 = vld [vmem:[%s2341_s3 + $0x98] sm:$0xff]  ;;  %v1128_v37 = vld [vmem:[%s2341_s3 + $0x130] sm:$0xff] }
 0x104   :  { %1765 = vmatprep.subr.bf16.mxu1 %v1764_v41  ;;  %v1784_v40 = vpack.c.bf16 %v1109_v36, %v1108_v35  ;;  %v1092_v41 = vld [vmem:[%s2341_s3 + $0x10] sm:$0xff]  ;;  %v1822_v43 = vpack.c.bf16 %v1129_v38, %v1128_v37  ;;  %v1119_v35 = vld [vmem:[%s2341_s3 + $0xe8] sm:$0xff]  ;;  %v1102_v37 = vld [vmem:[%s2341_s3 + $0x60] sm:$0xff] }
 0x105   :  { %v1786_v46 = vpack.c.bf16 %v1093_v42, %v1092_v41  ;;  %v1103_v38 = vld [vmem:[%s2341_s3 + $0x68] sm:$0xff]  ;;  %v1149_v41 = vld [vmem:[%s2341_s3 + $0x1d8] sm:$0xff]  ;;  %v1120_v42 = vld [vmem:[%s2341_s3 + $0xf0] sm:$0xff] }
 0x106   :  { %1571 = vmatpush1.bf16.msra.mxu0 %v1570_v47  ;;  %v1825_v47 = vpack.c.bf16 %v1131_v45, %v1130_v44  ;;  %v1121_v44 = vld [vmem:[%s2341_s3 + $0xf8] sm:$0xff]  ;;  %v1104_v45 = vld [vmem:[%s2341_s3 + $0x70] sm:$0xff] }
 0x107   :  { %1767 = vmatpush1.bf16.msra.mxu1 %v1766_v48  ;;  %1573 = vmatprep.subr.bf16.mxu0 %v1572_v49  ;;  %v1132_v48 = vld [vmem:[%s2341_s3 + $0x150] sm:$0xff]  ;;  %v1133_v49 = vld [vmem:[%s2341_s3 + $0x158] sm:$0xff] }
 0x108   :  { %1769 = vmatprep.subr.bf16.mxu1 %v1768_v53  ;;  %v1828_v50 = vpack.c.bf16 %v1133_v49, %v1132_v48  ;;  %v1831_v53 = vpack.c.bf16 %v1135_v52, %v1134_v51  ;;  %v1150_v49 = vld [vmem:[%s2341_s3 + $0x1e0] sm:$0xff]  ;;  %v1152_v52 = vld [vmem:[%s2341_s3 + $0x1f0] sm:$0xf] }
 0x10a   :  { %1575 = vmatpush1.bf16.msra.mxu0 %v1574_v59  ;;  %v1837_v59 = vpack.c.bf16 %v1139_v58, %v1138_v57 }
 0x10b   :  { %1771 = vmatpush1.bf16.msra.mxu1 %v1770_v60  ;;  %1577 = vmatprep.subr.bf16.mxu0 %v1576_v61  ;;  %v1110_v60 = vld [vmem:[%s2341_s3 + $0xa0] sm:$0xff]  ;;  %v1111_v61 = vld [vmem:[%s2341_s3 + $0xa8] sm:$0xff] }
 0x10c   :  { %1773 = vmatprep.subr.bf16.mxu1 %v1772_v1  ;;  %v1788_v62 = vpack.c.bf16 %v1111_v61, %v1110_v60  ;;  %v1790_v1 = vpack.c.bf16 %v1095_v0, %v1094_v63 }
 0x10e   :  { %1579 = vmatpush1.bf16.msra.mxu0 %v1578_v5  ;;  %v1112_v5 = vld [vmem:[%s2341_s3 + $0xb0] sm:$0xff] }
 0x10f   :  { %1775 = vmatpush1.bf16.msra.mxu1 %v1774_v6  ;;  %1581 = vmatprep.subr.bf16.mxu0 %v1580_v7  ;;  %v1113_v6 = vld [vmem:[%s2341_s3 + $0xb8] sm:$0xff] }
 0x110   :  { %1812 = vmatprep.subr.bf16.mxu1 %v2034_v17  ;;  %v1792_v7 = vpack.c.bf16 %v1113_v6, %v1112_v5 }
 0x111   :  { %725 = vmatmul.mubr.f32.vlgmr.msra.gmra.mrb[0].mxu0 %v1892_v12 }
 0x112   :  { %1009 = vmatmul.mubr.f32.vlgmr.msra.gmra.mrb[0].mxu1 %v1892_v12  ;;  %1583 = vmatpush1.bf16.msra.mxu0 %v1582_v15  ;;  %v1143_v12 = vld [vmem:[%s2341_s3 + $0x1a8] sm:$0xff] }
 0x113   :  { %795 = vmatprep.mubr.f32.mxu0 %v2035_v21  ;;  %1777 = vmatprep.subr.bf16.mxu0 %v1776_v16  ;;  %v1843_v13 = vpack.c.bf16 %v1143_v12, %v1142_v10  ;;  %v1115_v15 = vld [vmem:[%s2341_s3 + $0xc8] sm:$0xff] }
 0x114   :  { %1814 = vmatpush1.bf16.msra.mxu1 %v1813_v18  ;;  %v1796_v16 = vpack.c.bf16 %v1115_v15, %v1114_v14  ;;  %v1098_v18 = vld [vmem:[%s2341_s3 + $0x40] sm:$0xff] }
 0x115   :  { %1815 = vmatprep.subr.bf16.mxu1 %v2034_v17  ;;  %v1798_v20 = vpack.c.bf16 %v1099_v19, %v1098_v18 }
 0x118   :  { %1817 = vmatpush1.bf16.msra.mxu1 %v1816_v24  ;;  %v1846_v24 = vpack.c.bf16 %v1145_v23, %v1144_v22 }
 0x119   :  { %1348 = vmatmul.mubr.msk.f32.vlgmr.msra.gmra.mrb[0].mxu0 %vm515_vm0, %v1895_v27  ;;  %1818 = vmatprep.subr.bf16.mxu1 %v2034_v17 }
 0x11a   :  { %1779 = vmatpush1.bf16.msra.mxu0 %v1778_v30  ;;  %1079 = vmatprep.mubr.f32.mxu0 %v2035_v21  ;;  %v1802_v30 = vpack.c.bf16 %v1101_v29, %v1100_v28 }
 0x11b   :  { %1781 = vmatprep.subr.bf16.mxu0 %v1780_v31  ;;  %v1146_v31 = vld [vmem:[%s2341_s3 + $0x1c0] sm:$0xff] }
 0x11c   :  { %1820 = vmatpush1.bf16.msra.mxu1 %v1819_v34  ;;  %v1849_v33 = vpack.c.bf16 %v1147_v32, %v1146_v31  ;;  %v1118_v34 = vld [vmem:[%s2341_s3 + $0xe0] sm:$0xff] }
 0x11d   :  { %1349 = vmatmul.mubr.msk.f32.vlgmr.msra.gmra.mrb[2].mxu0 %vm515_vm0, %v1895_v27  ;;  %1821 = vmatprep.subr.bf16.mxu1 %v2034_v17  ;;  %v1800_v27 = vpack.c.bf16 %v1117_v26, %v1116_v25  ;;  %v1804_v36 = vpack.c.bf16 %v1119_v35, %v1118_v34 }
 0x11e   :  { %1783 = vmatpush3.bf16.msra.mxu0 %v1782_v39  ;;  %v1806_v39 = vpack.c.bf16 %v1103_v38, %v1102_v37 }
 0x11f   :  { %1785 = vmatprep.subr.bf16.mxu0 %v1784_v40  ;;  %v1148_v40 = vld [vmem:[%s2341_s3 + $0x1d0] sm:$0xff] }
 0x120   :  { %1823 = vmatpush1.bf16.msra.mxu1 %v1822_v43  ;;  %v1852_v43 = vpack.c.bf16 %v1149_v41, %v1148_v40 }
 0x121   :  { %1824 = vmatprep.subr.bf16.mxu1 %v2034_v17 }
 0x122   :  { %1787 = vmatpush3.bf16.msra.mxu0 %v1786_v46  ;;  %v1105_v46 = vld [vmem:[%s2341_s3 + $0x78] sm:$0xff] }
 0x123   :  { %1789 = vmatprep.subr.bf16.mxu0 %v1788_v62  ;;  %v1810_v48 = vpack.c.bf16 %v1105_v46, %v1104_v45 }
 0x124   :  { %1826 = vmatpush1.bf16.msra.mxu1 %v1825_v47  ;;  %v1808_v47 = vpack.c.bf16 %v1121_v44, %v1120_v42 }
 0x125   :  { %1827 = vmatprep.subr.bf16.mxu1 %v2034_v17 }
 0x126   :  { %1791 = vmatpush3.bf16.msra.mxu0 %v1790_v1 }
 0x127   :  { %1793 = vmatprep.subr.bf16.mxu0 %v1792_v7 }
 0x128   :  { %1829 = vmatpush1.bf16.msra.mxu1 %v1828_v50  ;;  %v1151_v50 = vld [vmem:[%s2341_s3 + $0x1e8] sm:$0xff] }
 0x129   :  { %1830 = vmatprep.subr.bf16.mxu1 %v2034_v17  ;;  %v1855_v51 = vpack.c.bf16 %v1151_v50, %v1150_v49 }
 0x12a   :  { %1795 = vmatpush3.bf16.msra.mxu0 %v1794_v11 }
 0x12b   :  { %1797 = vmatprep.subr.bf16.mxu0 %v1796_v16  ;;  %v1350_v16 = vld [vmem:[#allocation8] ss:$0 sm:$0xff] }
 0x12c   :  { %1832 = vmatpush1.bf16.msra.mxu1 %v1831_v53 }
 0x12d   :  { %1833 = vmatprep.subr.bf16.mxu1 %v2034_v17 }
 0x12e   :  { %1799 = vmatpush3.bf16.msra.mxu0 %v1798_v20 }
 0x12f   :  { %1801 = vmatprep.subr.bf16.mxu0 %v1800_v27 }
 0x130   :  { %1835 = vmatpush1.bf16.msra.mxu1 %v1834_v56 }
 0x131   :  { %1836 = vmatprep.subr.bf16.mxu1 %v2034_v17 }
 0x132   :  { %1803 = vmatpush3.bf16.msra.mxu0 %v1802_v30 }
 0x133   :  { %1805 = vmatprep.subr.bf16.mxu0 %v1804_v36 }
 0x134   :  { %1838 = vmatpush1.bf16.msra.mxu1 %v1837_v59  ;;  %v472_v59 = vld [vmem:[#allocation7] sm:$0xf] }
 0x135   :  { %1839 = vmatprep.subr.bf16.mxu1 %v2034_v17 }
 0x136   :  { %1807 = vmatpush3.bf16.msra.mxu0 %v1806_v39 }
 0x137   :  { %1809 = vmatprep.subr.bf16.mxu0 %v1808_v47 }
 0x138   :  { %1841 = vmatpush1.bf16.msra.mxu1 %v1840_v4 }
 0x139   :  { %1842 = vmatprep.subr.bf16.mxu1 %v2034_v17 }
 0x13a   :  { %1811 = vmatpush3.bf16.msra.mxu0 %v1810_v48 }
 0x13c   :  { %1844 = vmatpush1.bf16.msra.mxu1 %v1843_v13 }
 0x13d   :  { %1845 = vmatprep.subr.bf16.mxu1 %v2034_v17 }
 0x140   :  { %1847 = vmatpush1.bf16.msra.mxu1 %v1846_v24 }
 0x141   :  { %1848 = vmatprep.subr.bf16.mxu1 %v2034_v17 }
 0x144   :  { %1850 = vmatpush1.bf16.msra.mxu1 %v1849_v33 }
 0x145   :  { %1851 = vmatprep.subr.bf16.mxu1 %v2034_v17 }
 0x148   :  { %1853 = vmatpush1.bf16.msra.mxu1 %v1852_v43 }
 0x149   :  { %1854 = vmatprep.subr.bf16.mxu1 %v2034_v17  ;;  %v474_v17 = vlaneseq }
 0x14b   :  { %v475_v53 = vshrl.u32 %v474_v17, 7  ;;  %v1309_v32 = vand.u32 127, %v474_v17 }
 0x14c   :  { %1856 = vmatpush1.bf16.msra.mxu1 %v1855_v51 }
 0x14d   :  { %1298 = vmatprep.subr.mxu1 %v2035_v21  ;;  %v476_v55 = vsub.s32 0, %v475_v53  ;;  %v480_v57 = vsub.s32 1, %v475_v53  ;;  %v484_v58 = vsub.s32 2, %v475_v53  ;;  %v488_v60 = vsub.s32 3, %v475_v53 }
 0x14e   :  { %vm1310_vm4 = vcmp.lt.s32.totalorder %v1309_v32, 20 }
 0x14f   :  { %v477_v61 = vrot.slane %v472_v59, %v476_v55  ;;  %v481_v62 = vrot.slane %v472_v59, %v480_v57  ;;  %v485_v63 = vrot.slane %v472_v59, %v484_v58  ;;  %v489_v0 = vrot.slane %v472_v59, %v488_v60 }
 0x150   :  { %1351 = vmatpush1.msk.msra.mxu1 %vm1164_vm1, %v1152_v52 }
 0x1e5   :  { %v1010_v54 = vpop.f32.mrb[0].mxu1 }
 0x1e6   :  { %v1012_v56 = vpop.f32.mrb[1].mxu1  ;;  %v1859_v4 = vadd.f32 %v1010_v54, %v485_v63 }
 0x1e7   :  { %v1861_v5 = vadd.f32 %v1012_v56, %v489_v0 }
 0x1ec   :  { %v797_v21 = vpop.f32.mrb[0].mxu0 }
 0x1ed   :  { %v1857_v1 = vadd.f32 %v797_v21, %v477_v61  ;;  %v799_v2 = vpop.f32.mrb[1].mxu0 }
 0x1ee   :  { %v1858_v3 = vadd.f32 %v799_v2, %v481_v62 }
 0x1f0   :  { %1896 = vtanh.f32 %v1858_v3  ;;  %v1081_v6 = vpop.f32.mrb[2].mxu0 }
 0x1f1   :  { %1898 = vtanh.f32 %v1857_v1  ;;  %v1860_v7 = vadd.f32 %v1859_v4, %v1081_v6  ;;  %v1083_v8 = vpop.f32.mrb[3].mxu0 }
 0x1f2   :  { %v1862_v9 = vadd.f32 %v1861_v5, %v1083_v8 }
 0x1f4   :  { %1900 = vtanh.f32 %v1862_v9 }
 0x1f5   :  { %1902 = vtanh.f32 %v1860_v7 }
 0x1fa   :  { %v1897_v10 = vpop.eup %1896 }
 0x1fb   :  { %v1899_v11 = vpop.eup %1898  ;;  %1232 = vmatprep.mubr.f32.mxu0 %v1897_v10 }
 0x1fc   :  { %1233 = vmatmul.mubr.f32.vlgmr.msra.gmra.mrb[4].mxu0 %v1899_v11 }
 0x1fe   :  { %v1901_v12 = vpop.eup %1900 }
 0x1ff   :  { %v1903_v13 = vpop.eup %1902  ;;  %1352 = vmatprep.mubr.msk.f32.mxu1 %vm1160_vm2, %v1901_v12 }
 0x200   :  { %1303 = vmatmul.mubr.f32.vlgmr.msra.gmra.mrb[2].mxu1 %v1903_v13 }
 0x2cf   :  { %v1385_v14 = vpop.f32.mrb[4].mxu0 }
 0x2d0   :  { %v1386_v15 = vpop.f32.mrb[5].mxu0 }
 0x2d1   :  { %v1387_v18 = vadd.f32 %v1386_v15, %v1385_v14 }
 0x2d3   :  { %v1235_v19 = vadd.f32 %v1387_v18, %v1350_v16  ;;  %v1304_v20 = vpop.f32.mrb[2].mxu1 }
 0x2d4   :  { %v1306_v22 = vpop.f32.mrb[3].mxu1 }
 0x2d5   :  { %v1305_v23 = vadd.f32 %v1304_v20, %v1235_v19 }
 0x2d7   :  { %v1312_v24 = vand.u32 2147483647, %v1305_v23  ;;  %v1311_v36 = vmax.f32 %v1305_v23, 0.0 }
 0x2d9   :  { %v1313_v25 = vsub.f32 0.0, %v1312_v24 }
 0x2db   :  { %v1314_v26 = vmul.f32 1.442695, %v1313_v25 }
 0x2dd   :  { %1904 = vpow2.f32 %v1314_v26 }
 0x2e7   :  { %v1905_v27 = vpop.eup %1904 }
 0x2e8   :  { %v1316_v28 = vadd.f32 1.0, %v1905_v27  ;;  %v1319_v29 = vmul.f32 -0.5, %v1905_v27  ;;  %v1322_v31 = vand.u32 2147483647, %v1905_v27 }
 0x2ea   :  { %1906 = vlog2.f32 %v1316_v28  ;;  %v1320_v30 = vadd.f32 1.0, %v1319_v29  ;;  %vm1323_vm3 = vcmp.lt.f32.partialorder %v1322_v31, 0.0004427343 }
 0x2ec   :  { %v1321_v35 = vmul.f32 %v1905_v27, %v1320_v30 }
 0x2f4   :  { %v1907_v33 = vpop.eup %1906 }
 0x2f5   :  { %v1318_v34 = vmul.f32 0.6931472, %v1907_v33 }
 0x2f7   :  { %v1324_v37 = vsel %vm1323_vm3, %v1321_v35, %v1318_v34 }
 0x2f8   :  { %v1325_v38 = vadd.f32 %v1324_v37, %v1311_v36 }
 0x2fa   :  { %v1326_v39 = vsel %vm1310_vm4, %v1305_v23, %v1325_v38 }
 0x2fb   :  { %1328 = vst.msk [vmem:[#allocation10] sm:$0xff] %vm1327_vm5, %v1326_v39 }
 0x2fc   :  { %1333 = vsyncadd [#allocation4], 64  ;;  %s2036_s3 = smov [#allocation10]  }
 0x2fd   :  { %s1334_s27 = sshll.u32 %s2036_s3, 4  ;;  %s1335_s27 = int_to_ptr.vmem [resolvable:$true] %s1334_s27 }
 0x2fe   :  { %s1996_s28 = scalar_lea.vmem %s1335_s27, 64  ;;  %s2000_s29 = scalar_lea.vmem %s1335_s27, 128 }
 0x2ff   :  { %p1997_p4 = scmp.ne.s32.totalorder %s1335_s27, %s1996_s28  ;;  %p2001_p5 = scmp.lt.s32.totalorder %s1335_s27, %s1335_s27 }
 0x300   :  { %p2002_p6 = scmp.lt.s32.totalorder %s2000_s29, %s1996_s28 }
 0x302   :  { %p2003_p7 = por %p2002_p6, %p2001_p5 }
 0x304   :  { %p2004_p8 = pnand %p2003_p7, %p1997_p4 }
 0x306   :  { %2007 = shalt.err (!%p2004_p8)
}
 0x307   :  { %s2008_s0 = scalar_lea.hbm %s2343_s5, 64 }
 0x308   :  { %p2009_p9 = scmp.ne.s32.totalorder %s2343_s5, %s2008_s0  ;;  %p2012_p10 = scmp.lt.u32.totalorder %s2008_s0, %s2343_s5 }
 0x30a   :  { %p2014_p11 = pnand %p2012_p10, %p2009_p9 }
 0x30c   :  { %2017 = shalt.err (!%p2014_p11)
}
 0x30d   :  { %s2037_s11 = smov 64   ;;  %s2038_s12 = smov 4  }
 0x30e   :  { %1340 = dma.vmem_to_hbm [thread:$0]  %s1335_s27, 64, %s2343_s5, [#allocation4], %s2037_s11, %s2037_s11, %s2038_s12  }
 0x30f   :  { %2024 = dma.done.wait [#allocation4], 128  }
 0x310   :  { %2025 = vsyncadd [#allocation4], 4294967168 }
 0x311   :  { %1344 = vsyncpa [#allocation3], 1 }
 0x312   :  { %1345 = vsyncpa [#allocation6], 1 }
 0x313   :  { %1346 = vsyncpa [#allocation9], 1 }
 0x314   :  { %1347 = vsyncpa [#allocation4], 1 }

</bundles_post_ra>
